<compile_context>
chip_gen: v7x
topology: tpu7x:2x2x1
jax: 0.10.0
libtpu: 0.0.40
codegen_flags: <defaults>
</compile_context>

<pallas_src>
import functools
import warnings

import jax
import jax.numpy as jnp
from jax.experimental import pallas as pl
from jax.experimental.pallas import tpu as pltpu


def _inception_branch_kernel(x_ref, w_hw_ref, b_hw_ref, w_w_ref, b_w_ref,
                             w_h_ref, b_h_ref, o_ref, *, gc, H, W, sq_k,
                             band_k):
    """One (batch, branch) grid step: depthwise conv of one (gc, H*W) group.

    x_ref / o_ref : (gc, H*W)   lane-dense conv channel group (aliased buffers)
    w_*_ref       : (gc, taps)  per-channel filter taps
    b_*_ref       : (gc, 1)     per-channel bias
    branch id (pl.program_id(1)): 0 -> sq_k x sq_k, 1 -> 1 x band_k, 2 -> band_k x 1
    """
    HW = H * W
    branch = pl.program_id(1)

    x = x_ref[...]                                           # native dtype (bf16 stays bf16)
    pos = jax.lax.broadcasted_iota(jnp.int32, (gc, HW), 1)   # flat spatial index

    def row_mask(di):
        # Single-sided compare is exact: for di < 0 only the lower bound can
        # fail, for di > 0 only the upper bound.  Derived from pos (no // W).
        if di < 0:
            return pos >= (-di) * W
        if di > 0:
            return pos < (H - di) * W
        return None

    def run_branch(w_ref, b_ref, kh, kw):
        w = w_ref[...].astype(jnp.float32)                   # (gc, kh*kw)
        w_cols = [w[:, t:t + 1] for t in range(kh * kw)]     # hoisted static slices
        # Bias folded into the accumulator init (saves a broadcast + add).
        acc = jnp.broadcast_to(b_ref[...].astype(jnp.float32), (gc, HW))

        col = (pos % W) if kw > 1 else None                  # only branches that need it

        def col_mask(dj):
            if dj < 0:
                return col >= -dj
            if dj > 0:
                return col < (W - dj)
            return None

        for i in range(kh):                                  # static unroll (<= 11)
            di = i - kh // 2
            # Per-di prepass: one row roll + one row mask, reused by all dj taps.
            xr = pltpu.roll(x, shift=(-di * W) % HW, axis=1) if di else x
            rm = row_mask(di)
            if rm is not None:
                xr = jnp.where(rm, xr, 0.0)
            for j in range(kw):                              # static unroll (<= 11)
                dj = j - kw // 2
                xs = pltpu.roll(xr, shift=(-dj) % HW, axis=1) if dj else xr
                cm = col_mask(dj) if kw > 1 else None
                if cm is not None:
                    xs = jnp.where(cm, xs, 0.0)
                acc = acc + xs * w_cols[i * kw + j]          # widen to f32 at the MAC
        o_ref[...] = acc.astype(o_ref.dtype)

    @pl.when(branch == 0)
    def _():
        run_branch(w_hw_ref, b_hw_ref, sq_k, sq_k)           # square k x k

    @pl.when(branch == 1)
    def _():
        run_branch(w_w_ref, b_w_ref, 1, band_k)              # 1 x band

    @pl.when(branch == 2)
    def _():
        run_branch(w_h_ref, b_h_ref, band_k, 1)              # band x 1


def inception_dwconv2d(x, params, gc, square_kernel_size=3, band_kernel_size=11):
    """Forward pass equivalent of InceptionDWConv2d.forward (NCHW).

    The result aliases `x`'s buffer via input_output_aliases; donate `x` at the
    jit boundary to get true in-place execution (a defensive copy is inserted
    otherwise, which is still numerically correct).
    """
    assert square_kernel_size % 2 == 1 and band_kernel_size % 2 == 1, (
        "'same'-padding math assumes odd kernel sizes (as in the PyTorch module)")
    N, C, H, W = x.shape
    id_ch = C - 3 * gc
    HW = H * W
    assert gc > 0 and id_ch >= 0
    # Aligned channel-group fast path: holds for branch_ratio = 1/8 whenever
    # C % 8 == 0 (every standard InceptionNeXt config).
    assert C % gc == 0 and id_ch % gc == 0, (
        "TODO(synk): id_ch not a multiple of gc needs an unaligned fallback")
    n_groups = C // gc
    id_groups = id_ch // gc

    # Free reshapes (contiguous trailing dims): channel groups + lane-dense H*W.
    xg = x.reshape(N, n_groups, gc, HW)
    sq_taps = square_kernel_size * square_kernel_size
    w_hw = params["w_hw"].reshape(gc, sq_taps)
    b_hw = params["b_hw"].reshape(gc, 1)
    w_w = params["w_w"].reshape(gc, band_kernel_size)
    b_w = params["b_w"].reshape(gc, 1)
    w_h = params["w_h"].reshape(gc, band_kernel_size)
    b_h = params["b_h"].reshape(gc, 1)

    kernel = functools.partial(
        _inception_branch_kernel, gc=gc, H=H, W=W,
        sq_k=square_kernel_size, band_k=band_kernel_size)

    def conv_group_spec():
        # (gc, HW) block == full trailing array dims -> layout-legal and
        # sublane-aligned in its own VMEM buffer.  Only the three conv groups
        # [id_groups, n_groups) are ever mapped; identity groups are untouched
        # (they keep the aliased input data).
        return pl.BlockSpec((pl.Squeezed(), pl.Squeezed(), gc, HW),
                            lambda n, b: (n, id_groups + b, 0, 0))

    def full_spec(shape):
        return pl.BlockSpec(shape, lambda n, b: (0, 0))

    out = pl.pallas_call(
        kernel,
        out_shape=jax.ShapeDtypeStruct((N, n_groups, gc, HW), x.dtype),
        grid=(N, 3),
        in_specs=[
            conv_group_spec(),
            full_spec((gc, sq_taps)), full_spec((gc, 1)),
            full_spec((gc, band_kernel_size)), full_spec((gc, 1)),
            full_spec((gc, band_kernel_size)), full_spec((gc, 1)),
        ],
        out_specs=conv_group_spec(),
        input_output_aliases={0: 0},            # output buffer IS the input buffer
        compiler_params=pltpu.CompilerParams(
            dimension_semantics=("parallel", "parallel"),
            # Explicit scoped-VMEM limit (v5e default is only 16 MiB); the
            # per-step footprint here is a few double-buffered (gc, H*W) slabs.
            vmem_limit_bytes=32 * 1024 * 1024),
    )(xg, w_hw, b_hw, w_w, b_w, w_h, b_h)
    return out.reshape(N, C, H, W)


def init_params(key, in_channels, square_kernel_size=3, band_kernel_size=11,
                branch_ratio=0.125):
    gc = int(in_channels * branch_ratio)
    ks = jax.random.split(key, 6)
    s = 0.1
    params = {
        "w_hw": s * jax.random.normal(
            ks[0], (gc, 1, square_kernel_size, square_kernel_size), jnp.float32),
        "b_hw": s * jax.random.normal(ks[1], (gc,), jnp.float32),
        "w_w": s * jax.random.normal(
            ks[2], (gc, 1, 1, band_kernel_size), jnp.float32),
        "b_w": s * jax.random.normal(ks[3], (gc,), jnp.float32),
        "w_h": s * jax.random.normal(
            ks[4], (gc, 1, band_kernel_size, 1), jnp.float32),
        "b_h": s * jax.random.normal(ks[5], (gc,), jnp.float32),
    }
    return params, gc


def _dwconv_ref(x, weight, bias, kh, kw):
    """Pure-JAX reference (lax conv) for correctness checking."""
    gc = x.shape[1]
    out = jax.lax.conv_general_dilated(
        x, weight, window_strides=(1, 1),
        padding=((kh // 2, kh // 2), (kw // 2, kw // 2)),
        dimension_numbers=("NCHW", "OIHW", "NCHW"),
        feature_group_count=gc)
    return out + bias[None, :, None, None]


if __name__ == "__main__":
    key = jax.random.PRNGKey(0)
    kx, kp = jax.random.split(key)

    N, C, H, W = 2, 32, 16, 16            # gc = int(32 * 0.125) = 4, id_ch = 20
    x = jax.random.normal(kx, (N, C, H, W), jnp.float32)
    params, gc = init_params(kp, C)
    id_ch = C - 3 * gc

    # Reference computed BEFORE the kernel call because x is donated below.
    ref = jnp.concatenate([
        x[:, :id_ch],
        _dwconv_ref(x[:, id_ch:id_ch + gc], params["w_hw"], params["b_hw"], 3, 3),
        _dwconv_ref(x[:, id_ch + gc:id_ch + 2 * gc], params["w_w"], params["b_w"], 1, 11),
        _dwconv_ref(x[:, id_ch + 2 * gc:], params["w_h"], params["b_h"], 11, 1),
    ], axis=1)
    ref = jax.block_until_ready(ref)

    # Donate x so input_output_aliases can reuse its HBM buffer in place.
    # (Advisory-only filter: keeps demo output clean should XLA decline the alias.)
    warnings.filterwarnings("ignore", message="Some donated buffers were not usable")
    fwd = jax.jit(lambda xx: inception_dwconv2d(xx, params, gc), donate_argnums=0)
    y = jax.block_until_ready(fwd(x))
    del x                                  # donated; must not be used afterwards

    assert y.shape == (N, C, H, W), y.shape
    err = float(jnp.max(jnp.abs(y - ref)))
    assert jnp.allclose(y, ref, atol=1e-4, rtol=1e-4), err
    print("KERNEL_OK")
</pallas_src>

<mosaic_0001>
module attributes {stable_mosaic.version = 11 : i64} {
  func.func @_inception_branch_kernel(%arg0: i32, %arg1: i32, %arg2: memref<1x1x4x256xf32, #tpu.memory_space<vmem>>, %arg3: memref<4x9xf32, #tpu.memory_space<vmem>>, %arg4: memref<4x1xf32, #tpu.memory_space<vmem>>, %arg5: memref<4x11xf32, #tpu.memory_space<vmem>>, %arg6: memref<4x1xf32, #tpu.memory_space<vmem>>, %arg7: memref<4x11xf32, #tpu.memory_space<vmem>>, %arg8: memref<4x1xf32, #tpu.memory_space<vmem>>, %arg9: memref<1x1x4x256xf32, #tpu.memory_space<vmem>>) attributes {dimension_semantics = [#tpu.dimension_semantics<parallel>, #tpu.dimension_semantics<parallel>], iteration_bounds = array<i64: 2, 3>, scalar_prefetch = 0 : i64, scratch_operands = 0 : i64, tpu.core_type = #tpu.core_type<tc>, window_params = [{transform_indices = @transform_0, window_bounds = array<i64: 1, 1, 4, 256>}, {pipeline_mode = #tpu.pipeline_mode<synchronous>, transform_indices = @transform_1, window_bounds = array<i64: 4, 9>}, {pipeline_mode = #tpu.pipeline_mode<synchronous>, transform_indices = @transform_2, window_bounds = array<i64: 4, 1>}, {pipeline_mode = #tpu.pipeline_mode<synchronous>, transform_indices = @transform_3, window_bounds = array<i64: 4, 11>}, {pipeline_mode = #tpu.pipeline_mode<synchronous>, transform_indices = @transform_4, window_bounds = array<i64: 4, 1>}, {pipeline_mode = #tpu.pipeline_mode<synchronous>, transform_indices = @transform_5, window_bounds = array<i64: 4, 11>}, {pipeline_mode = #tpu.pipeline_mode<synchronous>, transform_indices = @transform_6, window_bounds = array<i64: 4, 1>}, {transform_indices = @transform_7, window_bounds = array<i64: 1, 1, 4, 256>}]} {
    %c0 = arith.constant 0 : index
    %c0_0 = arith.constant 0 : index
    %c0_1 = arith.constant 0 : index
    %c0_2 = arith.constant 0 : index
    %0 = vector.load %arg2[%c0, %c0_0, %c0_1, %c0_2] : memref<1x1x4x256xf32, #tpu.memory_space<vmem>>, vector<1x1x4x256xf32>
    %1 = vector.shape_cast %0 : vector<1x1x4x256xf32> to vector<4x256xf32>
    %2 = tpu.iota {dimensions = array<i32: 1>} : vector<4x256xi32>
    %c0_i32 = arith.constant 0 : i32
    %3 = arith.cmpi eq, %arg1, %c0_i32 : i32
    %4 = arith.extui %3 : i1 to i32
    %c0_i32_3 = arith.constant 0 : i32
    %5 = arith.cmpi ne, %4, %c0_i32_3 : i32
    scf.if %5 {
      %c0_6 = arith.constant 0 : index
      %c0_7 = arith.constant 0 : index
      %12 = vector.load %arg3[%c0_6, %c0_7] : memref<4x9xf32, #tpu.memory_space<vmem>>, vector<4x9xf32>
      %13 = vector.extract_strided_slice %12 {offsets = [0, 0], sizes = [4, 1], strides = [1, 1]} : vector<4x9xf32> to vector<4x1xf32>
      %14 = vector.extract_strided_slice %12 {offsets = [0, 1], sizes = [4, 1], strides = [1, 1]} : vector<4x9xf32> to vector<4x1xf32>
      %15 = vector.extract_strided_slice %12 {offsets = [0, 2], sizes = [4, 1], strides = [1, 1]} : vector<4x9xf32> to vector<4x1xf32>
      %16 = vector.extract_strided_slice %12 {offsets = [0, 3], sizes = [4, 1], strides = [1, 1]} : vector<4x9xf32> to vector<4x1xf32>
      %17 = vector.extract_strided_slice %12 {offsets = [0, 4], sizes = [4, 1], strides = [1, 1]} : vector<4x9xf32> to vector<4x1xf32>
      %18 = vector.extract_strided_slice %12 {offsets = [0, 5], sizes = [4, 1], strides = [1, 1]} : vector<4x9xf32> to vector<4x1xf32>
      %19 = vector.extract_strided_slice %12 {offsets = [0, 6], sizes = [4, 1], strides = [1, 1]} : vector<4x9xf32> to vector<4x1xf32>
      %20 = vector.extract_strided_slice %12 {offsets = [0, 7], sizes = [4, 1], strides = [1, 1]} : vector<4x9xf32> to vector<4x1xf32>
      %21 = vector.extract_strided_slice %12 {offsets = [0, 8], sizes = [4, 1], strides = [1, 1]} : vector<4x9xf32> to vector<4x1xf32>
      %c0_8 = arith.constant 0 : index
      %c0_9 = arith.constant 0 : index
      %22 = vector.load %arg4[%c0_8, %c0_9] : memref<4x1xf32, #tpu.memory_space<vmem>>, vector<4x1xf32>
      %23 = vector.shape_cast %22 : vector<4x1xf32> to vector<4x1xf32>
      %24 = vector.broadcast %23 : vector<4x1xf32> to vector<4x256xf32>
      %c16_i32 = arith.constant 16 : i32
      %c0_i32_10 = arith.constant 0 : i32
      %25 = arith.cmpi eq, %c16_i32, %c0_i32_10 : i32
      %c1_i32_11 = arith.constant 1 : i32
      %26 = arith.select %25, %c1_i32_11, %c16_i32 : i32
      %27 = vector.broadcast %26 : i32 to vector<4x256xi32>
      %28 = arith.remsi %2, %27 : vector<4x256xi32>
      %c0_i32_12 = arith.constant 0 : i32
      %29 = vector.broadcast %c0_i32_12 : i32 to vector<4x256xi32>
      %30 = arith.cmpi ne, %28, %29 : vector<4x256xi32>
      %c0_i32_13 = arith.constant 0 : i32
      %31 = vector.broadcast %c0_i32_13 : i32 to vector<4x256xi32>
      %32 = arith.cmpi slt, %28, %31 : vector<4x256xi32>
      %c0_i32_14 = arith.constant 0 : i32
      %33 = arith.cmpi slt, %26, %c0_i32_14 : i32
      %34 = vector.broadcast %33 : i1 to vector<4x256xi1>
      %35 = vector.broadcast %34 : vector<4x256xi1> to vector<4x256xi1>
      %36 = arith.xori %32, %35 : vector<4x256xi1>
      %37 = arith.andi %36, %30 : vector<4x256xi1>
      %38 = vector.broadcast %26 : i32 to vector<4x256xi32>
      %39 = arith.addi %28, %38 : vector<4x256xi32>
      %40 = arith.select %37, %39, %28 : vector<4x256xi1>, vector<4x256xi32>
      %c16_i32_15 = arith.constant 16 : i32
      %41 = tpu.dynamic_rotate %1 by %c16_i32_15 dim 1 : vector<4x256xf32>, i32 -> vector<4x256xf32>
      %c16_i32_16 = arith.constant 16 : i32
      %42 = vector.broadcast %c16_i32_16 : i32 to vector<4x256xi32>
      %43 = arith.cmpi sge, %2, %42 : vector<4x256xi32>
      %cst = arith.constant 0.000000e+00 : f32
      %44 = vector.broadcast %cst : f32 to vector<4x256xf32>
      %45 = arith.select %43, %41, %44 : vector<4x256xi1>, vector<4x256xf32>
      %c1_i32_17 = arith.constant 1 : i32
      %46 = tpu.dynamic_rotate %45 by %c1_i32_17 dim 1 : vector<4x256xf32>, i32 -> vector<4x256xf32>
      %c1_i32_18 = arith.constant 1 : i32
      %47 = vector.broadcast %c1_i32_18 : i32 to vector<4x256xi32>
      %48 = arith.cmpi sge, %40, %47 : vector<4x256xi32>
      %cst_19 = arith.constant 0.000000e+00 : f32
      %49 = vector.broadcast %cst_19 : f32 to vector<4x256xf32>
      %50 = arith.select %48, %46, %49 : vector<4x256xi1>, vector<4x256xf32>
      %51 = vector.broadcast %13 : vector<4x1xf32> to vector<4x256xf32>
      %52 = arith.mulf %50, %51 : vector<4x256xf32>
      %53 = arith.addf %24, %52 : vector<4x256xf32>
      %54 = vector.broadcast %14 : vector<4x1xf32> to vector<4x256xf32>
      %55 = arith.mulf %45, %54 : vector<4x256xf32>
      %56 = arith.addf %53, %55 : vector<4x256xf32>
      %c255_i32 = arith.constant 255 : i32
      %57 = tpu.dynamic_rotate %45 by %c255_i32 dim 1 : vector<4x256xf32>, i32 -> vector<4x256xf32>
      %c15_i32 = arith.constant 15 : i32
      %58 = vector.broadcast %c15_i32 : i32 to vector<4x256xi32>
      %59 = arith.cmpi slt, %40, %58 : vector<4x256xi32>
      %cst_20 = arith.constant 0.000000e+00 : f32
      %60 = vector.broadcast %cst_20 : f32 to vector<4x256xf32>
      %61 = arith.select %59, %57, %60 : vector<4x256xi1>, vector<4x256xf32>
      %62 = vector.broadcast %15 : vector<4x1xf32> to vector<4x256xf32>
      %63 = arith.mulf %61, %62 : vector<4x256xf32>
      %64 = arith.addf %56, %63 : vector<4x256xf32>
      %c1_i32_21 = arith.constant 1 : i32
      %65 = tpu.dynamic_rotate %1 by %c1_i32_21 dim 1 : vector<4x256xf32>, i32 -> vector<4x256xf32>
      %c1_i32_22 = arith.constant 1 : i32
      %66 = vector.broadcast %c1_i32_22 : i32 to vector<4x256xi32>
      %67 = arith.cmpi sge, %40, %66 : vector<4x256xi32>
      %cst_23 = arith.constant 0.000000e+00 : f32
      %68 = vector.broadcast %cst_23 : f32 to vector<4x256xf32>
      %69 = arith.select %67, %65, %68 : vector<4x256xi1>, vector<4x256xf32>
      %70 = vector.broadcast %16 : vector<4x1xf32> to vector<4x256xf32>
      %71 = arith.mulf %69, %70 : vector<4x256xf32>
      %72 = arith.addf %64, %71 : vector<4x256xf32>
      %73 = vector.broadcast %17 : vector<4x1xf32> to vector<4x256xf32>
      %74 = arith.mulf %1, %73 : vector<4x256xf32>
      %75 = arith.addf %72, %74 : vector<4x256xf32>
      %c255_i32_24 = arith.constant 255 : i32
      %76 = tpu.dynamic_rotate %1 by %c255_i32_24 dim 1 : vector<4x256xf32>, i32 -> vector<4x256xf32>
      %c15_i32_25 = arith.constant 15 : i32
      %77 = vector.broadcast %c15_i32_25 : i32 to vector<4x256xi32>
      %78 = arith.cmpi slt, %40, %77 : vector<4x256xi32>
      %cst_26 = arith.constant 0.000000e+00 : f32
      %79 = vector.broadcast %cst_26 : f32 to vector<4x256xf32>
      %80 = arith.select %78, %76, %79 : vector<4x256xi1>, vector<4x256xf32>
      %81 = vector.broadcast %18 : vector<4x1xf32> to vector<4x256xf32>
      %82 = arith.mulf %80, %81 : vector<4x256xf32>
      %83 = arith.addf %75, %82 : vector<4x256xf32>
      %c240_i32 = arith.constant 240 : i32
      %84 = tpu.dynamic_rotate %1 by %c240_i32 dim 1 : vector<4x256xf32>, i32 -> vector<4x256xf32>
      %c240_i32_27 = arith.constant 240 : i32
      %85 = vector.broadcast %c240_i32_27 : i32 to vector<4x256xi32>
      %86 = arith.cmpi slt, %2, %85 : vector<4x256xi32>
      %cst_28 = arith.constant 0.000000e+00 : f32
      %87 = vector.broadcast %cst_28 : f32 to vector<4x256xf32>
      %88 = arith.select %86, %84, %87 : vector<4x256xi1>, vector<4x256xf32>
      %c1_i32_29 = arith.constant 1 : i32
      %89 = tpu.dynamic_rotate %88 by %c1_i32_29 dim 1 : vector<4x256xf32>, i32 -> vector<4x256xf32>
      %c1_i32_30 = arith.constant 1 : i32
      %90 = vector.broadcast %c1_i32_30 : i32 to vector<4x256xi32>
      %91 = arith.cmpi sge, %40, %90 : vector<4x256xi32>
      %cst_31 = arith.constant 0.000000e+00 : f32
      %92 = vector.broadcast %cst_31 : f32 to vector<4x256xf32>
      %93 = arith.select %91, %89, %92 : vector<4x256xi1>, vector<4x256xf32>
      %94 = vector.broadcast %19 : vector<4x1xf32> to vector<4x256xf32>
      %95 = arith.mulf %93, %94 : vector<4x256xf32>
      %96 = arith.addf %83, %95 : vector<4x256xf32>
      %97 = vector.broadcast %20 : vector<4x1xf32> to vector<4x256xf32>
      %98 = arith.mulf %88, %97 : vector<4x256xf32>
      %99 = arith.addf %96, %98 : vector<4x256xf32>
      %c255_i32_32 = arith.constant 255 : i32
      %100 = tpu.dynamic_rotate %88 by %c255_i32_32 dim 1 : vector<4x256xf32>, i32 -> vector<4x256xf32>
      %c15_i32_33 = arith.constant 15 : i32
      %101 = vector.broadcast %c15_i32_33 : i32 to vector<4x256xi32>
      %102 = arith.cmpi slt, %40, %101 : vector<4x256xi32>
      %cst_34 = arith.constant 0.000000e+00 : f32
      %103 = vector.broadcast %cst_34 : f32 to vector<4x256xf32>
      %104 = arith.select %102, %100, %103 : vector<4x256xi1>, vector<4x256xf32>
      %105 = vector.broadcast %21 : vector<4x1xf32> to vector<4x256xf32>
      %106 = arith.mulf %104, %105 : vector<4x256xf32>
      %107 = arith.addf %99, %106 : vector<4x256xf32>
      %c0_35 = arith.constant 0 : index
      %c0_36 = arith.constant 0 : index
      %c0_37 = arith.constant 0 : index
      %c0_38 = arith.constant 0 : index
      %108 = vector.load %arg9[%c0_35, %c0_36, %c0_37, %c0_38] : memref<1x1x4x256xf32, #tpu.memory_space<vmem>>, vector<1x1x4x256xf32>
      %109 = vector.shape_cast %108 : vector<1x1x4x256xf32> to vector<4x256xf32>
      %110 = vector.shape_cast %107 : vector<4x256xf32> to vector<1x1x4x256xf32>
      tpu.vector_store %arg9[%c0_35, %c0_36, %c0_37, %c0_38], %110 {strides = array<i32>} : memref<1x1x4x256xf32, #tpu.memory_space<vmem>>, vector<1x1x4x256xf32>,
    } else {
    }
    %c1_i32 = arith.constant 1 : i32
    %6 = arith.cmpi eq, %arg1, %c1_i32 : i32
    %7 = arith.extui %6 : i1 to i32
    %c0_i32_4 = arith.constant 0 : i32
    %8 = arith.cmpi ne, %7, %c0_i32_4 : i32
    scf.if %8 {
      %c0_6 = arith.constant 0 : index
      %c0_7 = arith.constant 0 : index
      %12 = vector.load %arg5[%c0_6, %c0_7] : memref<4x11xf32, #tpu.memory_space<vmem>>, vector<4x11xf32>
      %13 = vector.extract_strided_slice %12 {offsets = [0, 0], sizes = [4, 1], strides = [1, 1]} : vector<4x11xf32> to vector<4x1xf32>
      %14 = vector.extract_strided_slice %12 {offsets = [0, 1], sizes = [4, 1], strides = [1, 1]} : vector<4x11xf32> to vector<4x1xf32>
      %15 = vector.extract_strided_slice %12 {offsets = [0, 2], sizes = [4, 1], strides = [1, 1]} : vector<4x11xf32> to vector<4x1xf32>
      %16 = vector.extract_strided_slice %12 {offsets = [0, 3], sizes = [4, 1], strides = [1, 1]} : vector<4x11xf32> to vector<4x1xf32>
      %17 = vector.extract_strided_slice %12 {offsets = [0, 4], sizes = [4, 1], strides = [1, 1]} : vector<4x11xf32> to vector<4x1xf32>
      %18 = vector.extract_strided_slice %12 {offsets = [0, 5], sizes = [4, 1], strides = [1, 1]} : vector<4x11xf32> to vector<4x1xf32>
      %19 = vector.extract_strided_slice %12 {offsets = [0, 6], sizes = [4, 1], strides = [1, 1]} : vector<4x11xf32> to vector<4x1xf32>
      %20 = vector.extract_strided_slice %12 {offsets = [0, 7], sizes = [4, 1], strides = [1, 1]} : vector<4x11xf32> to vector<4x1xf32>
      %21 = vector.extract_strided_slice %12 {offsets = [0, 8], sizes = [4, 1], strides = [1, 1]} : vector<4x11xf32> to vector<4x1xf32>
      %22 = vector.extract_strided_slice %12 {offsets = [0, 9], sizes = [4, 1], strides = [1, 1]} : vector<4x11xf32> to vector<4x1xf32>
      %23 = vector.extract_strided_slice %12 {offsets = [0, 10], sizes = [4, 1], strides = [1, 1]} : vector<4x11xf32> to vector<4x1xf32>
      %c0_8 = arith.constant 0 : index
      %c0_9 = arith.constant 0 : index
      %24 = vector.load %arg6[%c0_8, %c0_9] : memref<4x1xf32, #tpu.memory_space<vmem>>, vector<4x1xf32>
      %25 = vector.shape_cast %24 : vector<4x1xf32> to vector<4x1xf32>
      %26 = vector.broadcast %25 : vector<4x1xf32> to vector<4x256xf32>
      %c16_i32 = arith.constant 16 : i32
      %c0_i32_10 = arith.constant 0 : i32
      %27 = arith.cmpi eq, %c16_i32, %c0_i32_10 : i32
      %c1_i32_11 = arith.constant 1 : i32
      %28 = arith.select %27, %c1_i32_11, %c16_i32 : i32
      %29 = vector.broadcast %28 : i32 to vector<4x256xi32>
      %30 = arith.remsi %2, %29 : vector<4x256xi32>
      %c0_i32_12 = arith.constant 0 : i32
      %31 = vector.broadcast %c0_i32_12 : i32 to vector<4x256xi32>
      %32 = arith.cmpi ne, %30, %31 : vector<4x256xi32>
      %c0_i32_13 = arith.constant 0 : i32
      %33 = vector.broadcast %c0_i32_13 : i32 to vector<4x256xi32>
      %34 = arith.cmpi slt, %30, %33 : vector<4x256xi32>
      %c0_i32_14 = arith.constant 0 : i32
      %35 = arith.cmpi slt, %28, %c0_i32_14 : i32
      %36 = vector.broadcast %35 : i1 to vector<4x256xi1>
      %37 = vector.broadcast %36 : vector<4x256xi1> to vector<4x256xi1>
      %38 = arith.xori %34, %37 : vector<4x256xi1>
      %39 = arith.andi %38, %32 : vector<4x256xi1>
      %40 = vector.broadcast %28 : i32 to vector<4x256xi32>
      %41 = arith.addi %30, %40 : vector<4x256xi32>
      %42 = arith.select %39, %41, %30 : vector<4x256xi1>, vector<4x256xi32>
      %c5_i32 = arith.constant 5 : i32
      %43 = tpu.dynamic_rotate %1 by %c5_i32 dim 1 : vector<4x256xf32>, i32 -> vector<4x256xf32>
      %c5_i32_15 = arith.constant 5 : i32
      %44 = vector.broadcast %c5_i32_15 : i32 to vector<4x256xi32>
      %45 = arith.cmpi sge, %42, %44 : vector<4x256xi32>
      %cst = arith.constant 0.000000e+00 : f32
      %46 = vector.broadcast %cst : f32 to vector<4x256xf32>
      %47 = arith.select %45, %43, %46 : vector<4x256xi1>, vector<4x256xf32>
      %48 = vector.broadcast %13 : vector<4x1xf32> to vector<4x256xf32>
      %49 = arith.mulf %47, %48 : vector<4x256xf32>
      %50 = arith.addf %26, %49 : vector<4x256xf32>
      %c4_i32 = arith.constant 4 : i32
      %51 = tpu.dynamic_rotate %1 by %c4_i32 dim 1 : vector<4x256xf32>, i32 -> vector<4x256xf32>
      %c4_i32_16 = arith.constant 4 : i32
      %52 = vector.broadcast %c4_i32_16 : i32 to vector<4x256xi32>
      %53 = arith.cmpi sge, %42, %52 : vector<4x256xi32>
      %cst_17 = arith.constant 0.000000e+00 : f32
      %54 = vector.broadcast %cst_17 : f32 to vector<4x256xf32>
      %55 = arith.select %53, %51, %54 : vector<4x256xi1>, vector<4x256xf32>
      %56 = vector.broadcast %14 : vector<4x1xf32> to vector<4x256xf32>
      %57 = arith.mulf %55, %56 : vector<4x256xf32>
      %58 = arith.addf %50, %57 : vector<4x256xf32>
      %c3_i32 = arith.constant 3 : i32
      %59 = tpu.dynamic_rotate %1 by %c3_i32 dim 1 : vector<4x256xf32>, i32 -> vector<4x256xf32>
      %c3_i32_18 = arith.constant 3 : i32
      %60 = vector.broadcast %c3_i32_18 : i32 to vector<4x256xi32>
      %61 = arith.cmpi sge, %42, %60 : vector<4x256xi32>
      %cst_19 = arith.constant 0.000000e+00 : f32
      %62 = vector.broadcast %cst_19 : f32 to vector<4x256xf32>
      %63 = arith.select %61, %59, %62 : vector<4x256xi1>, vector<4x256xf32>
      %64 = vector.broadcast %15 : vector<4x1xf32> to vector<4x256xf32>
      %65 = arith.mulf %63, %64 : vector<4x256xf32>
      %66 = arith.addf %58, %65 : vector<4x256xf32>
      %c2_i32_20 = arith.constant 2 : i32
      %67 = tpu.dynamic_rotate %1 by %c2_i32_20 dim 1 : vector<4x256xf32>, i32 -> vector<4x256xf32>
      %c2_i32_21 = arith.constant 2 : i32
      %68 = vector.broadcast %c2_i32_21 : i32 to vector<4x256xi32>
      %69 = arith.cmpi sge, %42, %68 : vector<4x256xi32>
      %cst_22 = arith.constant 0.000000e+00 : f32
      %70 = vector.broadcast %cst_22 : f32 to vector<4x256xf32>
      %71 = arith.select %69, %67, %70 : vector<4x256xi1>, vector<4x256xf32>
      %72 = vector.broadcast %16 : vector<4x1xf32> to vector<4x256xf32>
      %73 = arith.mulf %71, %72 : vector<4x256xf32>
      %74 = arith.addf %66, %73 : vector<4x256xf32>
      %c1_i32_23 = arith.constant 1 : i32
      %75 = tpu.dynamic_rotate %1 by %c1_i32_23 dim 1 : vector<4x256xf32>, i32 -> vector<4x256xf32>
      %c1_i32_24 = arith.constant 1 : i32
      %76 = vector.broadcast %c1_i32_24 : i32 to vector<4x256xi32>
      %77 = arith.cmpi sge, %42, %76 : vector<4x256xi32>
      %cst_25 = arith.constant 0.000000e+00 : f32
      %78 = vector.broadcast %cst_25 : f32 to vector<4x256xf32>
      %79 = arith.select %77, %75, %78 : vector<4x256xi1>, vector<4x256xf32>
      %80 = vector.broadcast %17 : vector<4x1xf32> to vector<4x256xf32>
      %81 = arith.mulf %79, %80 : vector<4x256xf32>
      %82 = arith.addf %74, %81 : vector<4x256xf32>
      %83 = vector.broadcast %18 : vector<4x1xf32> to vector<4x256xf32>
      %84 = arith.mulf %1, %83 : vector<4x256xf32>
      %85 = arith.addf %82, %84 : vector<4x256xf32>
      %c255_i32 = arith.constant 255 : i32
      %86 = tpu.dynamic_rotate %1 by %c255_i32 dim 1 : vector<4x256xf32>, i32 -> vector<4x256xf32>
      %c15_i32 = arith.constant 15 : i32
      %87 = vector.broadcast %c15_i32 : i32 to vector<4x256xi32>
      %88 = arith.cmpi slt, %42, %87 : vector<4x256xi32>
      %cst_26 = arith.constant 0.000000e+00 : f32
      %89 = vector.broadcast %cst_26 : f32 to vector<4x256xf32>
      %90 = arith.select %88, %86, %89 : vector<4x256xi1>, vector<4x256xf32>
      %91 = vector.broadcast %19 : vector<4x1xf32> to vector<4x256xf32>
      %92 = arith.mulf %90, %91 : vector<4x256xf32>
      %93 = arith.addf %85, %92 : vector<4x256xf32>
      %c254_i32 = arith.constant 254 : i32
      %94 = tpu.dynamic_rotate %1 by %c254_i32 dim 1 : vector<4x256xf32>, i32 -> vector<4x256xf32>
      %c14_i32 = arith.constant 14 : i32
      %95 = vector.broadcast %c14_i32 : i32 to vector<4x256xi32>
      %96 = arith.cmpi slt, %42, %95 : vector<4x256xi32>
      %cst_27 = arith.constant 0.000000e+00 : f32
      %97 = vector.broadcast %cst_27 : f32 to vector<4x256xf32>
      %98 = arith.select %96, %94, %97 : vector<4x256xi1>, vector<4x256xf32>
      %99 = vector.broadcast %20 : vector<4x1xf32> to vector<4x256xf32>
      %100 = arith.mulf %98, %99 : vector<4x256xf32>
      %101 = arith.addf %93, %100 : vector<4x256xf32>
      %c253_i32 = arith.constant 253 : i32
      %102 = tpu.dynamic_rotate %1 by %c253_i32 dim 1 : vector<4x256xf32>, i32 -> vector<4x256xf32>
      %c13_i32 = arith.constant 13 : i32
      %103 = vector.broadcast %c13_i32 : i32 to vector<4x256xi32>
      %104 = arith.cmpi slt, %42, %103 : vector<4x256xi32>
      %cst_28 = arith.constant 0.000000e+00 : f32
      %105 = vector.broadcast %cst_28 : f32 to vector<4x256xf32>
      %106 = arith.select %104, %102, %105 : vector<4x256xi1>, vector<4x256xf32>
      %107 = vector.broadcast %21 : vector<4x1xf32> to vector<4x256xf32>
      %108 = arith.mulf %106, %107 : vector<4x256xf32>
      %109 = arith.addf %101, %108 : vector<4x256xf32>
      %c252_i32 = arith.constant 252 : i32
      %110 = tpu.dynamic_rotate %1 by %c252_i32 dim 1 : vector<4x256xf32>, i32 -> vector<4x256xf32>
      %c12_i32 = arith.constant 12 : i32
      %111 = vector.broadcast %c12_i32 : i32 to vector<4x256xi32>
      %112 = arith.cmpi slt, %42, %111 : vector<4x256xi32>
      %cst_29 = arith.constant 0.000000e+00 : f32
      %113 = vector.broadcast %cst_29 : f32 to vector<4x256xf32>
      %114 = arith.select %112, %110, %113 : vector<4x256xi1>, vector<4x256xf32>
      %115 = vector.broadcast %22 : vector<4x1xf32> to vector<4x256xf32>
      %116 = arith.mulf %114, %115 : vector<4x256xf32>
      %117 = arith.addf %109, %116 : vector<4x256xf32>
      %c251_i32 = arith.constant 251 : i32
      %118 = tpu.dynamic_rotate %1 by %c251_i32 dim 1 : vector<4x256xf32>, i32 -> vector<4x256xf32>
      %c11_i32 = arith.constant 11 : i32
      %119 = vector.broadcast %c11_i32 : i32 to vector<4x256xi32>
      %120 = arith.cmpi slt, %42, %119 : vector<4x256xi32>
      %cst_30 = arith.constant 0.000000e+00 : f32
      %121 = vector.broadcast %cst_30 : f32 to vector<4x256xf32>
      %122 = arith.select %120, %118, %121 : vector<4x256xi1>, vector<4x256xf32>
      %123 = vector.broadcast %23 : vector<4x1xf32> to vector<4x256xf32>
      %124 = arith.mulf %122, %123 : vector<4x256xf32>
      %125 = arith.addf %117, %124 : vector<4x256xf32>
      %c0_31 = arith.constant 0 : index
      %c0_32 = arith.constant 0 : index
      %c0_33 = arith.constant 0 : index
      %c0_34 = arith.constant 0 : index
      %126 = vector.load %arg9[%c0_31, %c0_32, %c0_33, %c0_34] : memref<1x1x4x256xf32, #tpu.memory_space<vmem>>, vector<1x1x4x256xf32>
      %127 = vector.shape_cast %126 : vector<1x1x4x256xf32> to vector<4x256xf32>
      %128 = vector.shape_cast %125 : vector<4x256xf32> to vector<1x1x4x256xf32>
      tpu.vector_store %arg9[%c0_31, %c0_32, %c0_33, %c0_34], %128 {strides = array<i32>} : memref<1x1x4x256xf32, #tpu.memory_space<vmem>>, vector<1x1x4x256xf32>,
    } else {
    }
    %c2_i32 = arith.constant 2 : i32
    %9 = arith.cmpi eq, %arg1, %c2_i32 : i32
    %10 = arith.extui %9 : i1 to i32
    %c0_i32_5 = arith.constant 0 : i32
    %11 = arith.cmpi ne, %10, %c0_i32_5 : i32
    scf.if %11 {
      %c0_6 = arith.constant 0 : index
      %c0_7 = arith.constant 0 : index
      %12 = vector.load %arg7[%c0_6, %c0_7] : memref<4x11xf32, #tpu.memory_space<vmem>>, vector<4x11xf32>
      %13 = vector.extract_strided_slice %12 {offsets = [0, 0], sizes = [4, 1], strides = [1, 1]} : vector<4x11xf32> to vector<4x1xf32>
      %14 = vector.extract_strided_slice %12 {offsets = [0, 1], sizes = [4, 1], strides = [1, 1]} : vector<4x11xf32> to vector<4x1xf32>
      %15 = vector.extract_strided_slice %12 {offsets = [0, 2], sizes = [4, 1], strides = [1, 1]} : vector<4x11xf32> to vector<4x1xf32>
      %16 = vector.extract_strided_slice %12 {offsets = [0, 3], sizes = [4, 1], strides = [1, 1]} : vector<4x11xf32> to vector<4x1xf32>
      %17 = vector.extract_strided_slice %12 {offsets = [0, 4], sizes = [4, 1], strides = [1, 1]} : vector<4x11xf32> to vector<4x1xf32>
      %18 = vector.extract_strided_slice %12 {offsets = [0, 5], sizes = [4, 1], strides = [1, 1]} : vector<4x11xf32> to vector<4x1xf32>
      %19 = vector.extract_strided_slice %12 {offsets = [0, 6], sizes = [4, 1], strides = [1, 1]} : vector<4x11xf32> to vector<4x1xf32>
      %20 = vector.extract_strided_slice %12 {offsets = [0, 7], sizes = [4, 1], strides = [1, 1]} : vector<4x11xf32> to vector<4x1xf32>
      %21 = vector.extract_strided_slice %12 {offsets = [0, 8], sizes = [4, 1], strides = [1, 1]} : vector<4x11xf32> to vector<4x1xf32>
      %22 = vector.extract_strided_slice %12 {offsets = [0, 9], sizes = [4, 1], strides = [1, 1]} : vector<4x11xf32> to vector<4x1xf32>
      %23 = vector.extract_strided_slice %12 {offsets = [0, 10], sizes = [4, 1], strides = [1, 1]} : vector<4x11xf32> to vector<4x1xf32>
      %c0_8 = arith.constant 0 : index
      %c0_9 = arith.constant 0 : index
      %24 = vector.load %arg8[%c0_8, %c0_9] : memref<4x1xf32, #tpu.memory_space<vmem>>, vector<4x1xf32>
      %25 = vector.shape_cast %24 : vector<4x1xf32> to vector<4x1xf32>
      %26 = vector.broadcast %25 : vector<4x1xf32> to vector<4x256xf32>
      %c80_i32 = arith.constant 80 : i32
      %27 = tpu.dynamic_rotate %1 by %c80_i32 dim 1 : vector<4x256xf32>, i32 -> vector<4x256xf32>
      %c80_i32_10 = arith.constant 80 : i32
      %28 = vector.broadcast %c80_i32_10 : i32 to vector<4x256xi32>
      %29 = arith.cmpi sge, %2, %28 : vector<4x256xi32>
      %cst = arith.constant 0.000000e+00 : f32
      %30 = vector.broadcast %cst : f32 to vector<4x256xf32>
      %31 = arith.select %29, %27, %30 : vector<4x256xi1>, vector<4x256xf32>
      %32 = vector.broadcast %13 : vector<4x1xf32> to vector<4x256xf32>
      %33 = arith.mulf %31, %32 : vector<4x256xf32>
      %34 = arith.addf %26, %33 : vector<4x256xf32>
      %c64_i32 = arith.constant 64 : i32
      %35 = tpu.dynamic_rotate %1 by %c64_i32 dim 1 : vector<4x256xf32>, i32 -> vector<4x256xf32>
      %c64_i32_11 = arith.constant 64 : i32
      %36 = vector.broadcast %c64_i32_11 : i32 to vector<4x256xi32>
      %37 = arith.cmpi sge, %2, %36 : vector<4x256xi32>
      %cst_12 = arith.constant 0.000000e+00 : f32
      %38 = vector.broadcast %cst_12 : f32 to vector<4x256xf32>
      %39 = arith.select %37, %35, %38 : vector<4x256xi1>, vector<4x256xf32>
      %40 = vector.broadcast %14 : vector<4x1xf32> to vector<4x256xf32>
      %41 = arith.mulf %39, %40 : vector<4x256xf32>
      %42 = arith.addf %34, %41 : vector<4x256xf32>
      %c48_i32 = arith.constant 48 : i32
      %43 = tpu.dynamic_rotate %1 by %c48_i32 dim 1 : vector<4x256xf32>, i32 -> vector<4x256xf32>
      %c48_i32_13 = arith.constant 48 : i32
      %44 = vector.broadcast %c48_i32_13 : i32 to vector<4x256xi32>
      %45 = arith.cmpi sge, %2, %44 : vector<4x256xi32>
      %cst_14 = arith.constant 0.000000e+00 : f32
      %46 = vector.broadcast %cst_14 : f32 to vector<4x256xf32>
      %47 = arith.select %45, %43, %46 : vector<4x256xi1>, vector<4x256xf32>
      %48 = vector.broadcast %15 : vector<4x1xf32> to vector<4x256xf32>
      %49 = arith.mulf %47, %48 : vector<4x256xf32>
      %50 = arith.addf %42, %49 : vector<4x256xf32>
      %c32_i32 = arith.constant 32 : i32
      %51 = tpu.dynamic_rotate %1 by %c32_i32 dim 1 : vector<4x256xf32>, i32 -> vector<4x256xf32>
      %c32_i32_15 = arith.constant 32 : i32
      %52 = vector.broadcast %c32_i32_15 : i32 to vector<4x256xi32>
      %53 = arith.cmpi sge, %2, %52 : vector<4x256xi32>
      %cst_16 = arith.constant 0.000000e+00 : f32
      %54 = vector.broadcast %cst_16 : f32 to vector<4x256xf32>
      %55 = arith.select %53, %51, %54 : vector<4x256xi1>, vector<4x256xf32>
      %56 = vector.broadcast %16 : vector<4x1xf32> to vector<4x256xf32>
      %57 = arith.mulf %55, %56 : vector<4x256xf32>
      %58 = arith.addf %50, %57 : vector<4x256xf32>
      %c16_i32 = arith.constant 16 : i32
      %59 = tpu.dynamic_rotate %1 by %c16_i32 dim 1 : vector<4x256xf32>, i32 -> vector<4x256xf32>
      %c16_i32_17 = arith.constant 16 : i32
      %60 = vector.broadcast %c16_i32_17 : i32 to vector<4x256xi32>
      %61 = arith.cmpi sge, %2, %60 : vector<4x256xi32>
      %cst_18 = arith.constant 0.000000e+00 : f32
      %62 = vector.broadcast %cst_18 : f32 to vector<4x256xf32>
      %63 = arith.select %61, %59, %62 : vector<4x256xi1>, vector<4x256xf32>
      %64 = vector.broadcast %17 : vector<4x1xf32> to vector<4x256xf32>
      %65 = arith.mulf %63, %64 : vector<4x256xf32>
      %66 = arith.addf %58, %65 : vector<4x256xf32>
      %67 = vector.broadcast %18 : vector<4x1xf32> to vector<4x256xf32>
      %68 = arith.mulf %1, %67 : vector<4x256xf32>
      %69 = arith.addf %66, %68 : vector<4x256xf32>
      %c240_i32 = arith.constant 240 : i32
      %70 = tpu.dynamic_rotate %1 by %c240_i32 dim 1 : vector<4x256xf32>, i32 -> vector<4x256xf32>
      %c240_i32_19 = arith.constant 240 : i32
      %71 = vector.broadcast %c240_i32_19 : i32 to vector<4x256xi32>
      %72 = arith.cmpi slt, %2, %71 : vector<4x256xi32>
      %cst_20 = arith.constant 0.000000e+00 : f32
      %73 = vector.broadcast %cst_20 : f32 to vector<4x256xf32>
      %74 = arith.select %72, %70, %73 : vector<4x256xi1>, vector<4x256xf32>
      %75 = vector.broadcast %19 : vector<4x1xf32> to vector<4x256xf32>
      %76 = arith.mulf %74, %75 : vector<4x256xf32>
      %77 = arith.addf %69, %76 : vector<4x256xf32>
      %c224_i32 = arith.constant 224 : i32
      %78 = tpu.dynamic_rotate %1 by %c224_i32 dim 1 : vector<4x256xf32>, i32 -> vector<4x256xf32>
      %c224_i32_21 = arith.constant 224 : i32
      %79 = vector.broadcast %c224_i32_21 : i32 to vector<4x256xi32>
      %80 = arith.cmpi slt, %2, %79 : vector<4x256xi32>
      %cst_22 = arith.constant 0.000000e+00 : f32
      %81 = vector.broadcast %cst_22 : f32 to vector<4x256xf32>
      %82 = arith.select %80, %78, %81 : vector<4x256xi1>, vector<4x256xf32>
      %83 = vector.broadcast %20 : vector<4x1xf32> to vector<4x256xf32>
      %84 = arith.mulf %82, %83 : vector<4x256xf32>
      %85 = arith.addf %77, %84 : vector<4x256xf32>
      %c208_i32 = arith.constant 208 : i32
      %86 = tpu.dynamic_rotate %1 by %c208_i32 dim 1 : vector<4x256xf32>, i32 -> vector<4x256xf32>
      %c208_i32_23 = arith.constant 208 : i32
      %87 = vector.broadcast %c208_i32_23 : i32 to vector<4x256xi32>
      %88 = arith.cmpi slt, %2, %87 : vector<4x256xi32>
      %cst_24 = arith.constant 0.000000e+00 : f32
      %89 = vector.broadcast %cst_24 : f32 to vector<4x256xf32>
      %90 = arith.select %88, %86, %89 : vector<4x256xi1>, vector<4x256xf32>
      %91 = vector.broadcast %21 : vector<4x1xf32> to vector<4x256xf32>
      %92 = arith.mulf %90, %91 : vector<4x256xf32>
      %93 = arith.addf %85, %92 : vector<4x256xf32>
      %c192_i32 = arith.constant 192 : i32
      %94 = tpu.dynamic_rotate %1 by %c192_i32 dim 1 : vector<4x256xf32>, i32 -> vector<4x256xf32>
      %c192_i32_25 = arith.constant 192 : i32
      %95 = vector.broadcast %c192_i32_25 : i32 to vector<4x256xi32>
      %96 = arith.cmpi slt, %2, %95 : vector<4x256xi32>
      %cst_26 = arith.constant 0.000000e+00 : f32
      %97 = vector.broadcast %cst_26 : f32 to vector<4x256xf32>
      %98 = arith.select %96, %94, %97 : vector<4x256xi1>, vector<4x256xf32>
      %99 = vector.broadcast %22 : vector<4x1xf32> to vector<4x256xf32>
      %100 = arith.mulf %98, %99 : vector<4x256xf32>
      %101 = arith.addf %93, %100 : vector<4x256xf32>
      %c176_i32 = arith.constant 176 : i32
      %102 = tpu.dynamic_rotate %1 by %c176_i32 dim 1 : vector<4x256xf32>, i32 -> vector<4x256xf32>
      %c176_i32_27 = arith.constant 176 : i32
      %103 = vector.broadcast %c176_i32_27 : i32 to vector<4x256xi32>
      %104 = arith.cmpi slt, %2, %103 : vector<4x256xi32>
      %cst_28 = arith.constant 0.000000e+00 : f32
      %105 = vector.broadcast %cst_28 : f32 to vector<4x256xf32>
      %106 = arith.select %104, %102, %105 : vector<4x256xi1>, vector<4x256xf32>
      %107 = vector.broadcast %23 : vector<4x1xf32> to vector<4x256xf32>
      %108 = arith.mulf %106, %107 : vector<4x256xf32>
      %109 = arith.addf %101, %108 : vector<4x256xf32>
      %c0_29 = arith.constant 0 : index
      %c0_30 = arith.constant 0 : index
      %c0_31 = arith.constant 0 : index
      %c0_32 = arith.constant 0 : index
      %110 = vector.load %arg9[%c0_29, %c0_30, %c0_31, %c0_32] : memref<1x1x4x256xf32, #tpu.memory_space<vmem>>, vector<1x1x4x256xf32>
      %111 = vector.shape_cast %110 : vector<1x1x4x256xf32> to vector<4x256xf32>
      %112 = vector.shape_cast %109 : vector<4x256xf32> to vector<1x1x4x256xf32>
      tpu.vector_store %arg9[%c0_29, %c0_30, %c0_31, %c0_32], %112 {strides = array<i32>} : memref<1x1x4x256xf32, #tpu.memory_space<vmem>>, vector<1x1x4x256xf32>,
    } else {
    }
    return
  }
  func.func @transform_0(%arg0: i32, %arg1: i32) -> (i32, i32, i32, i32) {
    %c5_i32 = arith.constant 5 : i32
    %0 = arith.addi %c5_i32, %arg1 : i32
    %c0_i32 = arith.constant 0 : i32
    %c0_i32_0 = arith.constant 0 : i32
    %c0_i32_1 = arith.constant 0 : i32
    return %arg0, %0, %c0_i32, %c0_i32_0 : i32, i32, i32, i32
  }
  func.func @transform_1(%arg0: i32, %arg1: i32) -> (i32, i32) {
    %c0_i32 = arith.constant 0 : i32
    %c0_i32_0 = arith.constant 0 : i32
    %c0_i32_1 = arith.constant 0 : i32
    return %c0_i32, %c0_i32_0 : i32, i32
  }
  func.func @transform_2(%arg0: i32, %arg1: i32) -> (i32, i32) {
    %c0_i32 = arith.constant 0 : i32
    %c0_i32_0 = arith.constant 0 : i32
    %c0_i32_1 = arith.constant 0 : i32
    return %c0_i32, %c0_i32_0 : i32, i32
  }
  func.func @transform_3(%arg0: i32, %arg1: i32) -> (i32, i32) {
    %c0_i32 = arith.constant 0 : i32
    %c0_i32_0 = arith.constant 0 : i32
    %c0_i32_1 = arith.constant 0 : i32
    return %c0_i32, %c0_i32_0 : i32, i32
  }
  func.func @transform_4(%arg0: i32, %arg1: i32) -> (i32, i32) {
    %c0_i32 = arith.constant 0 : i32
    %c0_i32_0 = arith.constant 0 : i32
    %c0_i32_1 = arith.constant 0 : i32
    return %c0_i32, %c0_i32_0 : i32, i32
  }
  func.func @transform_5(%arg0: i32, %arg1: i32) -> (i32, i32) {
    %c0_i32 = arith.constant 0 : i32
    %c0_i32_0 = arith.constant 0 : i32
    %c0_i32_1 = arith.constant 0 : i32
    return %c0_i32, %c0_i32_0 : i32, i32
  }
  func.func @transform_6(%arg0: i32, %arg1: i32) -> (i32, i32) {
    %c0_i32 = arith.constant 0 : i32
    %c0_i32_0 = arith.constant 0 : i32
    %c0_i32_1 = arith.constant 0 : i32
    return %c0_i32, %c0_i32_0 : i32, i32
  }
  func.func @transform_7(%arg0: i32, %arg1: i32) -> (i32, i32, i32, i32) {
    %c5_i32 = arith.constant 5 : i32
    %0 = arith.addi %c5_i32, %arg1 : i32
    %c0_i32 = arith.constant 0 : i32
    %c0_i32_0 = arith.constant 0 : i32
    %c0_i32_1 = arith.constant 0 : i32
    return %arg0, %0, %c0_i32, %c0_i32_0 : i32, i32, i32, i32
  }
}

</mosaic_0001>

<bundles_post_ra>
// kernel: _lambda_.1
= control target key start
LH: loop header
LB: loop body
LE: loop exit
PB: predicated region body
PF: predicated region fallthrough
CT: control target
= control target key end

     0   :  { %s1367_s24 = smov 0   ;;  %s1369_s25 = smov 0   ;;  %s1737_s0 = inlined_call_operand.vmem [shape: f32[2,8,4,256], index: 0, kind: input, shape index: {}, may-alias: {0,7}]   ;;  %s1738_s1 = inlined_call_operand.vmem [shape: f32[4,9], index: 1, kind: input, shape index: {}]   ;;  %s1739_s2 = inlined_call_operand.vmem [shape: f32[4,1], index: 2, kind: input, shape index: {}]   ;;  %s1740_s3 = inlined_call_operand.vmem [shape: f32[4,11], index: 3, kind: input, shape index: {}]   ;;  %s1741_s4 = inlined_call_operand.vmem [shape: f32[4,1], index: 4, kind: input, shape index: {}]   ;;  %s1742_s5 = inlined_call_operand.vmem [shape: f32[4,11], index: 5, kind: input, shape index: {}]   ;;  %s1743_s6 = inlined_call_operand.vmem [shape: f32[4,1], index: 6, kind: input, shape index: {}]   ;;  %s1744_s7 = inlined_call_operand.vmem [shape: f32[2,8,4,256], index: 7, kind: output, shape index: {}, may-alias: {0,7}]  }
   0x1   :  { %s1371_s26 = smov 0   ;;  %s1373_s27 = smov 0  }
   0x2   :  { %s1375_s28 = smov 0  }
   0x3 LB: > { %s26_s29 = sadd.s32 1, %s1262_s26  ;;  %s29_s30 = sadd.s32 1, %s1266_s27  ;;  %s1270_s28 = sphi %s1375_s28, %s17_s28   ;;  %s1266_s27 = sphi %s1373_s27, %s1756_s27   ;;  %s1262_s26 = sphi %s1371_s26, %s1755_s26   ;;  %s1258_s25 = sphi %s1369_s25, %s1754_s25   ;;  %s1254_s24 = sphi %s1367_s24, %s1753_s24  }
   0x4   : > { %p27_p0 = scmp.ge.s32.totalorder %s26_s29, 3  ;;  %p1092_p1 = scmp.ge.s32.totalorder %s1270_s28, 1 }
   0x5   : > { %p263_p2 = scmp.lt.s32.totalorder %s1270_s28, 7 }
   0x6   : > { %s1758_s29 = smov (%p27_p0, %s26_s29), 0  ;;  %s1760_s30 = smov (!%p27_p0, %s29_s30), %s1266_s27 }
   0x7   : > { %p264_p3 = pnand %p1092_p1, %p263_p2  ;;  %p31_p4 = scmp.ge.s32.totalorder %s1760_s30, 2 }
   0x8   : > { %s305_s8 = sadd.s32 (!%p264_p3), 5, %s1254_s24  ;;  %p306_p5 = scmp.lt.s32.totalorder (!%p264_p3), %s1258_s25, 1  ;;  %v328_v0 = vlaneseq (!%p264_p3) }
   0x9   : > { %s1762_s30 = smov (%p31_p4, %s1760_s30), 0  ;;  %267 = sbr.rel (%p264_p3) target bundleno = 707 (0x2c3), region = 48 }
   0xa   : > { %p308_p6 = scmp.lt.s32.totalorder (!%p264_p3), %s305_s8, 7  ;;  %v1401_v1 = vand.u32 (!%p264_p3), 127, %v328_v0  ;;  %p1099_p7 = scmp.ne.s32.totalorder (!%p264_p3), %s1254_s24, 0 }
   0xc   : > { %v1404_v2 = vadd.s32 (!%p264_p3), 128, %v1401_v1 }
  0x10   : > { %s1764_s25 = smov (!%p306_p5, %s1258_s25), 1  ;;  %s1766_s8 = smov (!%p308_p6, %s305_s8), 7 }
  0x11   : > { %s1094_s9 = sshll.u32 %s1764_s25, 4  ;;  %s1093_s10 = sshll.u32 %s1766_s8, 1  ;;  %v1274_v5 = vmov (!%p1099_p7), 0   ;;  %v336_v6 = vld [vmem:[%s1739_s2] sm:$0xf] (!%p1099_p7)  ;;  %v1275_v8 = vmov (!%p1099_p7), 1  }
  0x12   : > { %s312_s11 = sadd.s32 %s1094_s9, %s1093_s10  ;;  %334 = sbr.rel (%p1099_p7) target bundleno = 299 (0x12b), region = 52  ;;  %1200 = vset.pattern.permute.xlu1 (!%p1099_p7), %v1274_v5  ;;  %1199 = vset.pattern.permute.xlu0 (!%p1099_p7), %v1274_v5  ;;  %v335_v7 = vld [vmem:[%s1738_s1] sm:$0xf] (!%p1099_p7)  ;;  %v1276_v9 = vmov (!%p1099_p7), 2   ;;  %v1277_v10 = vmov (!%p1099_p7), 4   ;;  %v1278_v11 = vmov (!%p1099_p7), 5  }
  0x13   : > { %s1095_s12 = sshll.u32 %s312_s11, 2  ;;  %s1272_s19 = smov (!%p1099_p7), 112   ;;  %v1279_v12 = vmov (!%p1099_p7), 3   ;;  %v1280_v13 = vmov (!%p1099_p7), 6   ;;  %v1282_v14 = vmov (!%p1099_p7), 8   ;;  %v1283_v15 = vmov (!%p1099_p7), 7  }
  0x14   : > { %s314_s15 = scalar_lea.vmem %s1737_s0, %s1095_s12  ;;  %s1412_s18 = scalar_lea.vmem %s1744_s7, %s1095_s12  ;;  %vm373_vm0 = vcmp.lt.s32.totalorder (!%p1099_p7), %v1401_v1, 16  ;;  %vm376_vm1 = vcmp.ge.s32.totalorder (!%p1099_p7), %v1401_v1, 16  ;;  %vm480_vm2 = vcmp.lt.s32.totalorder (!%p1099_p7), %v1401_v1, 112  ;;  %vm484_vm3 = vcmp.lt.s32.totalorder (!%p1099_p7), %v1404_v2, 240 }
  0x15   : > { %v1414_v3 = vld [vmem:[%s314_s15] sm:$0xff]  ;;  %s1273_s20 = smov (!%p1099_p7), 16   ;;  %s1281_s8 = smov (!%p1099_p7), 1   ;;  %v346_v38 = vand.u32 (!%p1099_p7), 15, %v1401_v1  ;;  %v353_v39 = vand.u32 (!%p1099_p7), 15, %v1404_v2  ;;  %vm384_vm4 = vcmp.lt.s32.totalorder (!%p1099_p7), %v1401_v1, 1 }
  0x16   : > { %476 = vrot.lane.b32.xlu1 (!%p1099_p7), %v1414_v3, %s1272_s19  ;;  %369 = vrot.lane.b32.xlu0 (!%p1099_p7), %v1414_v3, %s1273_s20  ;;  %v367_v4 = vcombine.high (!%p1099_p7), %v1414_v3, %v1414_v3  ;;  %s1284_s9 = smov (!%p1099_p7), 127   ;;  %v1285_v46 = vmov (!%p1099_p7), 839922192   ;;  %vm412_vm7 = vcmp.lt.s32.totalorder (!%p1099_p7), %v1401_v1, 127  ;;  %v450_v54 = vshrl.u32 (!%p1099_p7), %v328_v0, 7 }
  0x17   : > { %vm1456_vm5 = vcmp.ge.s32.totalorder (!%p1099_p7), %v346_v38, 1  ;;  %vm1460_vm6 = vcmp.ge.s32.totalorder (!%p1099_p7), %v353_v39, 1  ;;  %v447_v47 = vunpack.c.l.s4 (!%p1099_p7), %v1285_v46  ;;  %vm1474_vm8 = vcmp.lt.s32.totalorder (!%p1099_p7), %v346_v38, 15 }
  0x18   : > { %vm1478_vm9 = vcmp.lt.s32.totalorder (!%p1099_p7), %v353_v39, 15 }
  0x19   : > { %v448_v53 = vunpack.c.0.s8 %v447_v47 }
  0x1a   : > { %478 = vrot.lane.b32.xlu1 %v367_v4, %s1272_s19  ;;  %371 = vrot.lane.b32.xlu0 %v367_v4, %s1273_s20 }
  0x1b   : > { %v451_v63 = vsub.s32 %v448_v53, %v450_v54 }
  0x1e   : > { %339 = vperm.xlu1 %1200, %v336_v6   ;;  %393 = vperm.xlu0 %1199, %v335_v7  }
  0x22   : > { %1201 = vset.pattern.permute.xlu1 %v1275_v8  ;;  %1202 = vset.pattern.permute.xlu0 %v1276_v9 }
  0x23   : > { %401 = vperm.xlu1 %1201, %v335_v7   ;;  %420 = vperm.xlu0 %1202, %v335_v7  }
  0x27   : > { %1203 = vset.pattern.permute.xlu1 %v1277_v10  ;;  %1205 = vset.pattern.permute.xlu0 %v1278_v11 }
  0x28   : > { %444 = vperm.xlu1 %1203, %v335_v7   ;;  %469 = vperm.xlu0 %1205, %v335_v7  }
  0x2c   : > { %1204 = vset.pattern.permute.xlu1 %v1279_v12  ;;  %1206 = vset.pattern.permute.xlu0 %v1280_v13 }
  0x2d   : > { %436 = vperm.xlu1 %1204, %v335_v7   ;;  %496 = vperm.xlu0 %1206, %v335_v7  }
  0x31   : > { %427 = vrot.lane.b32.xlu1 %v1414_v3, %s1281_s8  ;;  %1209 = vset.pattern.permute.xlu0 %v1282_v14 }
  0x32   : > { %1207 = vset.pattern.permute.xlu1 %v1283_v15 }
  0x35   : > { %429 = vrot.lane.b32.xlu1 %v367_v4, %s1281_s8 }
  0x39   : > { %504 = vperm.xlu1 %1207, %v335_v7  }
  0x3d   : > { %1208 = vset.pattern.permute.xlu1 %v1282_v14 }
  0x88   : > { %v370_v16 = vpop.permute.xlu0 %369  ;;  %v477_v20 = vpop.permute.xlu1 %476 }
  0x8c   : > { %v372_v17 = vpop.permute.xlu0 %371  ;;  %v479_v22 = vpop.permute.xlu1 %478 }
  0x8d   : > { %v374_v18 = vsel %vm373_vm0, %v370_v16, %v372_v17  ;;  %v375_v19 = vsel %vm373_vm0, %v372_v17, %v370_v16  ;;  %v1436_v23 = vsel %vm480_vm2, %v477_v20, %v479_v22  ;;  %v482_v24 = vsel %vm480_vm2, %v479_v22, %v477_v20 }
  0x8e   : > { %410 = vrot.lane.b32.xlu1 %v374_v18, %s1284_s9  ;;  %382 = vrot.lane.b32.xlu0 %v374_v18, %s1281_s8  ;;  %v378_v21 = vsel %vm376_vm1, %v375_v19, 0.0  ;;  %v1441_v25 = vsel %vm484_vm3, %v482_v24, 0.0 }
  0x92   : > { %380 = vrot.lane.b32.xlu1 %v378_v21, %s1281_s8  ;;  %408 = vrot.lane.b32.xlu0 %v378_v21, %s1284_s9 }
  0x96   : > { %460 = vrot.lane.b32.xlu1 %v1414_v3, %s1284_s9  ;;  %462 = vrot.lane.b32.xlu0 %v367_v4, %s1284_s9 }
  0x9a   : > { %520 = vperm.xlu1 %1208, %v335_v7   ;;  %487 = vrot.lane.b32.xlu0 %v1436_v23, %s1281_s8 }
  0x9d   : > { %v340_v26 = vpop.permute.xlu1 %339  ;;  %v394_v30 = vpop.permute.xlu0 %393 }
  0x9e   : > { %489 = vrot.lane.b32.xlu1 %v1441_v25, %s1281_s8  ;;  %511 = vrot.lane.b32.xlu0 %v1436_v23, %s1284_s9 }
  0xa2   : > { %513 = vrot.lane.b32.xlu1 %v1441_v25, %s1284_s9  ;;  %v402_v27 = vpop.permute.xlu1 %401  ;;  %v421_v32 = vpop.permute.xlu0 %420 }
  0xa3   : > { %v404_v61 = vmul.f32 %v402_v27, %v378_v21  ;;  %v405_v62 = vmul.f32 %v402_v27, %v374_v18 }
  0xa7   : > { %v445_v28 = vpop.permute.xlu1 %444  ;;  %v1447_v34 = vpop.permute.xlu0 %469 }
  0xa8   : > { %v452_v10 = vrot.slane %v445_v28, %v451_v63 }
  0xaa   : > { %v454_v19 = vmul.f32 %v452_v10, %v1414_v3 }
  0xac   : > { %v437_v29 = vpop.permute.xlu1 %436  ;;  %v1451_v36 = vpop.permute.xlu0 %496 }
  0xb0   : > { %v428_v31 = vpop.permute.xlu1 %427 }
  0xb4   : > { %v430_v33 = vpop.permute.xlu1 %429 }
  0xb5   : > { %v431_v6 = vsel %vm384_vm4, %v428_v31, %v430_v33  ;;  %v432_v7 = vsel %vm384_vm4, %v430_v33, %v428_v31 }
  0xb6   : > { %v433_v13 = vsel %vm1456_vm5, %v432_v7, 0.0  ;;  %v434_v14 = vsel %vm1460_vm6, %v431_v6, 0.0 }
  0xb7   : > { %v439_v20 = vmul.f32 %v437_v29, %v433_v13  ;;  %v440_v21 = vmul.f32 %v437_v29, %v434_v14 }
  0xb8   : > { %v1449_v35 = vpop.permute.xlu1 %504 }
 0x100   : > { %v411_v37 = vpop.permute.xlu1 %410  ;;  %v383_v40 = vpop.permute.xlu0 %382 }
 0x104   : > { %v381_v41 = vpop.permute.xlu1 %380  ;;  %v409_v52 = vpop.permute.xlu0 %408 }
 0x105   : > { %v385_v44 = vsel %vm384_vm4, %v381_v41, %v383_v40  ;;  %v386_v45 = vsel %vm384_vm4, %v383_v40, %v381_v41  ;;  %v413_v59 = vsel %vm412_vm7, %v409_v52, %v411_v37  ;;  %v414_v60 = vsel %vm412_vm7, %v411_v37, %v409_v52 }
 0x106   : > { %v389_v48 = vsel %vm1456_vm5, %v386_v45, 0.0  ;;  %v390_v49 = vsel %vm1460_vm6, %v385_v44, 0.0  ;;  %v417_v4 = vsel %vm1474_vm8, %v413_v59, 0.0  ;;  %v418_v5 = vsel %vm1478_vm9, %v414_v60, 0.0 }
 0x107   : > { %v396_v50 = vmul.f32 %v394_v30, %v389_v48  ;;  %v397_v51 = vmul.f32 %v394_v30, %v390_v49  ;;  %v423_v11 = vmul.f32 %v421_v32, %v417_v4  ;;  %v424_v12 = vmul.f32 %v421_v32, %v418_v5 }
 0x108   : > { %v461_v17 = vpop.permute.xlu1 %460  ;;  %v463_v18 = vpop.permute.xlu0 %462  ;;  %v456_v30 = vcombine.high %v454_v19, %v454_v19 }
 0x109   : > { %v398_v57 = vadd.f32 %v396_v50, %v340_v26  ;;  %v399_v58 = vadd.f32 %v397_v51, %v340_v26  ;;  %v464_v26 = vsel %vm412_vm7, %v461_v17, %v463_v18  ;;  %v465_v27 = vsel %vm412_vm7, %v463_v18, %v461_v17 }
 0x10a   : > { %v466_v31 = vsel %vm1474_vm8, %v464_v26, 0.0  ;;  %v467_v32 = vsel %vm1478_vm9, %v465_v27, 0.0  ;;  %v508_v51 = vmul.f32 %v1449_v35, %v1441_v25 }
 0x10b   : > { %v406_v8 = vadd.f32 %v404_v61, %v398_v57  ;;  %v407_v9 = vadd.f32 %v405_v62, %v399_v58  ;;  %v472_v39 = vmul.f32 %v1447_v34, %v466_v31  ;;  %v473_v40 = vmul.f32 %v1447_v34, %v467_v32 }
 0x10c   : > { %v488_v33 = vpop.permute.xlu0 %487  ;;  %v507_v34 = vmul.f32 %v1449_v35, %v1436_v23 }
 0x10d   : > { %v425_v15 = vadd.f32 %v423_v11, %v406_v8  ;;  %v426_v16 = vadd.f32 %v424_v12, %v407_v9 }
 0x10f   : > { %v441_v22 = vadd.f32 %v439_v20, %v425_v15  ;;  %v442_v24 = vadd.f32 %v440_v21, %v426_v16 }
 0x110   : > { %v512_v52 = vpop.permute.xlu0 %511 }
 0x111   : > { %v458_v37 = vadd.f32 %v454_v19, %v441_v22  ;;  %v459_v38 = vadd.f32 %v456_v30, %v442_v24 }
 0x113   : > { %v474_v47 = vadd.f32 %v472_v39, %v458_v37  ;;  %v475_v48 = vadd.f32 %v473_v40, %v459_v38 }
 0x119   : > { %v521_v28 = vpop.permute.xlu1 %520 }
 0x11d   : > { %v490_v29 = vpop.permute.xlu1 %489 }
 0x11e   : > { %v491_v41 = vsel %vm384_vm4, %v488_v33, %v490_v29  ;;  %v492_v44 = vsel %vm384_vm4, %v490_v29, %v488_v33 }
 0x11f   : > { %v493_v45 = vsel %vm1456_vm5, %v492_v44, 0.0  ;;  %v494_v46 = vsel %vm1460_vm6, %v491_v41, 0.0 }
 0x120   : > { %v499_v49 = vmul.f32 %v1451_v36, %v493_v45  ;;  %v500_v50 = vmul.f32 %v1451_v36, %v494_v46 }
 0x121   : > { %v514_v53 = vpop.permute.xlu1 %513 }
 0x122   : > { %v501_v42 = vadd.f32 %v499_v49, %v474_v47  ;;  %v502_v54 = vadd.f32 %v500_v50, %v475_v48  ;;  %v515_v43 = vsel %vm412_vm7, %v512_v52, %v514_v53  ;;  %v516_v57 = vsel %vm412_vm7, %v514_v53, %v512_v52 }
 0x123   : > { %v517_v36 = vsel %vm1474_vm8, %v515_v43, 0.0  ;;  %v518_v23 = vsel %vm1478_vm9, %v516_v57, 0.0 }
 0x124   : > { %v509_v58 = vadd.f32 %v507_v34, %v501_v42  ;;  %v510_v59 = vadd.f32 %v508_v51, %v502_v54  ;;  %v523_v25 = vmul.f32 %v521_v28, %v517_v36  ;;  %v524_v35 = vmul.f32 %v521_v28, %v518_v23 }
 0x126   : > { %v525_v60 = vadd.f32 %v523_v25, %v509_v58  ;;  %v526_v61 = vadd.f32 %v524_v35, %v510_v59 }
 0x128   : > { %v529_v62 = vcombine.low %v525_v60, %v526_v61 }
 0x12a   : > { %531 = vst [vmem:[%s1412_s18] sm:$0xff] %v529_v62 }
 0x12b PF: > { %p1100_p8 = scmp.ne.s32.totalorder %s1254_s24, 1 }
 0x12c   : > { %v536_v55 = vld [vmem:[%s1740_s3] sm:$0xf] (!%p1100_p8)  ;;  %v1286_v63 = vmov (!%p1100_p8), 1   ;;  %v1287_v56 = vmov (!%p1100_p8), 0   ;;  %v1288_v5 = vmov (!%p1100_p8), 2   ;;  %v568_v6 = vcombine.high (!%p1100_p8), %v1414_v3, %v1414_v3  ;;  %s1289_s14 = smov (!%p1100_p8), 5  }
 0x12d   : > { %535 = sbr.rel (%p1100_p8) target bundleno = 508 (0x1fc), region = 56  ;;  %1211 = vset.pattern.permute.xlu1 (!%p1100_p8), %v1286_v63  ;;  %1210 = vset.pattern.permute.xlu0 (!%p1100_p8), %v1287_v56  ;;  %v537_v4 = vld [vmem:[%s1741_s4] sm:$0xf] (!%p1100_p8)  ;;  %v1290_v7 = vmov (!%p1100_p8), 3   ;;  %v1291_v8 = vmov (!%p1100_p8), 5   ;;  %s1292_s15 = smov (!%p1100_p8), 4  }
 0x12e   : > { %602 = vperm.xlu1 (!%p1100_p8), %1211, %v536_v55   ;;  %583 = vperm.xlu0 (!%p1100_p8), %1210, %v536_v55   ;;  %v1293_v9 = vmov (!%p1100_p8), 6   ;;  %v1294_v10 = vmov (!%p1100_p8), 4   ;;  %s1295_s16 = smov (!%p1100_p8), 3   ;;  %s1296_s17 = smov (!%p1100_p8), 2   ;;  %v1297_v11 = vmov (!%p1100_p8), 8   ;;  %v1298_v12 = vmov (!%p1100_p8), 7  }
 0x12f   : > { %s1299_s19 = smov (!%p1100_p8), 1   ;;  %s1300_s20 = smov (!%p1100_p8), 127   ;;  %v1301_v13 = vmov (!%p1100_p8), 10   ;;  %v1303_v14 = vmov (!%p1100_p8), 9   ;;  %v1562_v38 = vand.u32 (!%p1100_p8), 15, %v1401_v1  ;;  %v1565_v29 = vand.u32 (!%p1100_p8), 15, %v1404_v2 }
 0x130   : > { %s1302_s21 = smov (!%p1100_p8), 126   ;;  %s1304_s22 = smov (!%p1100_p8), 124   ;;  %vm574_vm10 = vcmp.lt.s32.totalorder (!%p1100_p8), %v1401_v1, 5  ;;  %v1307_v39 = vmov (!%p1100_p8), 839922192   ;;  %vm594_vm13 = vcmp.lt.s32.totalorder (!%p1100_p8), %v1401_v1, 4 }
 0x131   : > { %s1305_s23 = smov (!%p1100_p8), 123   ;;  %s1306_s25 = smov (!%p1100_p8), 125   ;;  %v670_v40 = vunpack.c.l.s4 (!%p1100_p8), %v1307_v39  ;;  %vm577_vm11 = vcmp.ge.s32.totalorder (!%p1100_p8), %v1562_v38, 5  ;;  %vm578_vm12 = vcmp.ge.s32.totalorder (!%p1100_p8), %v1565_v29, 5  ;;  %v673_v48 = vshrl.u32 (!%p1100_p8), %v328_v0, 7 }
 0x132   : > { %1212 = vset.pattern.permute.xlu1 (!%p1100_p8), %v1288_v5  ;;  %540 = vperm.xlu0 (!%p1100_p8), %1210, %v537_v4   ;;  %vm597_vm14 = vcmp.ge.s32.totalorder (!%p1100_p8), %v1562_v38, 4  ;;  %vm598_vm15 = vcmp.ge.s32.totalorder (!%p1100_p8), %v1565_v29, 4  ;;  %vm613_vm0 = vcmp.lt.s32.totalorder (!%p1100_p8), %v1401_v1, 3  ;;  %vm616_vm1 = vcmp.ge.s32.totalorder (!%p1100_p8), %v1562_v38, 3 }
 0x133   : > { %621 = vperm.xlu1 (!%p1100_p8), %1212, %v536_v55   ;;  %v671_v47 = vunpack.c.0.s8 (!%p1100_p8), %v670_v40  ;;  %vm617_vm2 = vcmp.ge.s32.totalorder (!%p1100_p8), %v1565_v29, 3  ;;  %vm632_vm3 = vcmp.lt.s32.totalorder (!%p1100_p8), %v1401_v1, 2  ;;  %vm635_vm4 = vcmp.ge.s32.totalorder (!%p1100_p8), %v1562_v38, 2 }
 0x134   : > { %vm636_vm5 = vcmp.ge.s32.totalorder %v1565_v29, 2  ;;  %vm651_vm6 = vcmp.lt.s32.totalorder %v1401_v1, 1  ;;  %vm654_vm7 = vcmp.ge.s32.totalorder %v1562_v38, 1  ;;  %vm655_vm8 = vcmp.ge.s32.totalorder %v1565_v29, 1 }
 0x135   : > { %v674_v59 = vsub.s32 %v671_v47, %v673_v48  ;;  %vm687_vm9 = vcmp.lt.s32.totalorder %v1401_v1, 127 }
 0x136   : > { %570 = vrot.lane.b32.xlu0 %v1414_v3, %s1289_s14 }
 0x137   : > { %572 = vrot.lane.b32.xlu1 %v568_v6, %s1289_s14  ;;  %1213 = vset.pattern.permute.xlu0 %v1290_v7 }
 0x138   : > { %1214 = vset.pattern.permute.xlu1 %v1291_v8 }
 0x13a   : > { %640 = vperm.xlu0 %1213, %v536_v55  }
 0x13b   : > { %667 = vperm.xlu1 %1214, %v536_v55  }
 0x13e   : > { %592 = vrot.lane.b32.xlu0 %v568_v6, %s1292_s15 }
 0x13f   : > { %590 = vrot.lane.b32.xlu1 %v1414_v3, %s1292_s15  ;;  %1216 = vset.pattern.permute.xlu0 %v1293_v9 }
 0x140   : > { %1215 = vset.pattern.permute.xlu1 %v1294_v10 }
 0x142   : > { %609 = vrot.lane.b32.xlu0 %v1414_v3, %s1295_s16 }
 0x143   : > { %659 = vperm.xlu1 %1215, %v536_v55  }
 0x146   : > { %628 = vrot.lane.b32.xlu0 %v1414_v3, %s1296_s17 }
 0x147   : > { %611 = vrot.lane.b32.xlu1 %v568_v6, %s1295_s16 }
 0x148   : > { %1218 = vset.pattern.permute.xlu1 %v1297_v11 }
 0x14a   : > { %695 = vperm.xlu0 %1216, %v536_v55  }
 0x14b   : > { %630 = vrot.lane.b32.xlu1 %v568_v6, %s1296_s17 }
 0x14e   : > { %1217 = vset.pattern.permute.xlu0 %v1298_v12 }
 0x14f   : > { %647 = vrot.lane.b32.xlu1 %v1414_v3, %s1299_s19  ;;  %714 = vperm.xlu0 %1217, %v536_v55  }
 0x153   : > { %649 = vrot.lane.b32.xlu1 %v568_v6, %s1299_s19  ;;  %685 = vrot.lane.b32.xlu0 %v568_v6, %s1300_s20 }
 0x154   : > { %1220 = vset.pattern.permute.xlu0 %v1301_v13 }
 0x157   : > { %733 = vperm.xlu1 %1218, %v536_v55   ;;  %702 = vrot.lane.b32.xlu0 %v1414_v3, %s1302_s21 }
 0x15b   : > { %683 = vrot.lane.b32.xlu1 %v1414_v3, %s1300_s20  ;;  %771 = vperm.xlu0 %1220, %v536_v55  }
 0x15c   : > { %1219 = vset.pattern.permute.xlu1 %v1303_v14 }
 0x15f   : > { %752 = vperm.xlu1 %1219, %v536_v55   ;;  %740 = vrot.lane.b32.xlu0 %v1414_v3, %s1304_s22 }
 0x163   : > { %704 = vrot.lane.b32.xlu1 %v568_v6, %s1302_s21  ;;  %759 = vrot.lane.b32.xlu0 %v1414_v3, %s1305_s23 }
 0x167   : > { %721 = vrot.lane.b32.xlu1 %v1414_v3, %s1306_s25 }
 0x16b   : > { %723 = vrot.lane.b32.xlu1 %v568_v6, %s1306_s25 }
 0x16f   : > { %742 = vrot.lane.b32.xlu1 %v568_v6, %s1304_s22 }
 0x173   : > { %761 = vrot.lane.b32.xlu1 %v568_v6, %s1305_s23 }
 0x1ad   : > { %v603_v15 = vpop.permute.xlu1 %602  ;;  %v584_v16 = vpop.permute.xlu0 %583 }
 0x1b1   : > { %v541_v17 = vpop.permute.xlu0 %540 }
 0x1b2   : > { %v1551_v18 = vpop.permute.xlu1 %621 }
 0x1b5   : > { %v571_v19 = vpop.permute.xlu0 %570 }
 0x1b6   : > { %v573_v20 = vpop.permute.xlu1 %572 }
 0x1b7   : > { %v575_v44 = vsel %vm574_vm10, %v571_v19, %v573_v20  ;;  %v576_v45 = vsel %vm574_vm10, %v573_v20, %v571_v19  ;;  %vm690_vm10 = vcmp.lt.s32.totalorder %v1562_v38, 15 }
 0x1b8   : > { %v579_v50 = vsel %vm577_vm11, %v576_v45, 0.0  ;;  %v580_v34 = vsel %vm578_vm12, %v575_v44, 0.0  ;;  %vm691_vm11 = vcmp.lt.s32.totalorder %v1565_v29, 15  ;;  %vm706_vm12 = vcmp.lt.s32.totalorder %v1401_v1, 126 }
 0x1b9   : > { %v1553_v21 = vpop.permute.xlu0 %640  ;;  %v586_v54 = vmul.f32 %v584_v16, %v579_v50  ;;  %v587_v43 = vmul.f32 %v584_v16, %v580_v34 }
 0x1ba   : > { %v1555_v22 = vpop.permute.xlu1 %667 }
 0x1bb   : > { %v588_v63 = vadd.f32 %v586_v54, %v541_v17  ;;  %v589_v56 = vadd.f32 %v587_v43, %v541_v17  ;;  %v675_v11 = vrot.slane %v1555_v22, %v674_v59 }
 0x1bd   : > { %v593_v26 = vpop.permute.xlu0 %592 }
 0x1be   : > { %v591_v24 = vpop.permute.xlu1 %590 }
 0x1bf   : > { %v595_v51 = vsel %vm594_vm13, %v591_v24, %v593_v26  ;;  %v596_v52 = vsel %vm594_vm13, %v593_v26, %v591_v24  ;;  %vm709_vm13 = vcmp.lt.s32.totalorder %v1562_v38, 14 }
 0x1c0   : > { %v599_v57 = vsel %vm597_vm14, %v596_v52, 0.0  ;;  %v600_v36 = vsel %vm598_vm15, %v595_v51, 0.0  ;;  %vm710_vm14 = vcmp.lt.s32.totalorder %v1565_v29, 14  ;;  %vm725_vm15 = vcmp.lt.s32.totalorder %v1401_v1, 125 }
 0x1c1   : > { %v610_v28 = vpop.permute.xlu0 %609  ;;  %v605_v62 = vmul.f32 %v603_v15, %v599_v57  ;;  %v606_v55 = vmul.f32 %v603_v15, %v600_v36 }
 0x1c2   : > { %v1557_v27 = vpop.permute.xlu1 %659 }
 0x1c3   : > { %v607_v13 = vadd.f32 %v605_v62, %v588_v63  ;;  %v608_v14 = vadd.f32 %v606_v55, %v589_v56 }
 0x1c5   : > { %v629_v31 = vpop.permute.xlu0 %628 }
 0x1c6   : > { %v612_v30 = vpop.permute.xlu1 %611 }
 0x1c7   : > { %v614_v53 = vsel %vm613_vm0, %v610_v28, %v612_v30  ;;  %v615_v42 = vsel %vm613_vm0, %v612_v30, %v610_v28  ;;  %vm728_vm0 = vcmp.lt.s32.totalorder %v1562_v38, 13 }
 0x1c8   : > { %v618_v25 = vsel %vm616_vm1, %v615_v42, 0.0  ;;  %v619_v35 = vsel %vm617_vm2, %v614_v53, 0.0  ;;  %vm729_vm1 = vcmp.lt.s32.totalorder %v1565_v29, 13  ;;  %vm744_vm2 = vcmp.lt.s32.totalorder %v1401_v1, 124 }
 0x1c9   : > { %v1559_v33 = vpop.permute.xlu0 %695  ;;  %v624_v7 = vmul.f32 %v1551_v18, %v618_v25  ;;  %v625_v8 = vmul.f32 %v1551_v18, %v619_v35 }
 0x1ca   : > { %v631_v32 = vpop.permute.xlu1 %630 }
 0x1cb   : > { %v633_v60 = vsel %vm632_vm3, %v629_v31, %v631_v32  ;;  %v634_v61 = vsel %vm632_vm3, %v631_v32, %v629_v31  ;;  %v626_v20 = vadd.f32 %v624_v7, %v607_v13  ;;  %v627_v22 = vadd.f32 %v625_v8, %v608_v14 }
 0x1cc   : > { %v637_v9 = vsel %vm635_vm4, %v634_v61, 0.0  ;;  %v638_v10 = vsel %vm636_vm5, %v633_v60, 0.0  ;;  %v677_v31 = vmul.f32 %v675_v11, %v1414_v3  ;;  %vm747_vm3 = vcmp.lt.s32.totalorder %v1562_v38, 12 }
 0x1cd   : > { %v643_v17 = vmul.f32 %v1553_v21, %v637_v9  ;;  %v644_v18 = vmul.f32 %v1553_v21, %v638_v10  ;;  %vm748_vm4 = vcmp.lt.s32.totalorder %v1565_v29, 12  ;;  %vm763_vm5 = vcmp.lt.s32.totalorder %v1401_v1, 123 }
 0x1ce   : > { %v648_v37 = vpop.permute.xlu1 %647  ;;  %v1571_v46 = vpop.permute.xlu0 %714  ;;  %v679_v48 = vcombine.high %v677_v31, %v677_v31 }
 0x1cf   : > { %v645_v32 = vadd.f32 %v643_v17, %v626_v20 }
 0x1d2   : > { %v650_v41 = vpop.permute.xlu1 %649  ;;  %v686_v23 = vpop.permute.xlu0 %685 }
 0x1d3   : > { %v652_v4 = vsel %vm651_vm6, %v648_v37, %v650_v41  ;;  %v653_v5 = vsel %vm651_vm6, %v650_v41, %v648_v37  ;;  %v646_v37 = vadd.f32 %v644_v18, %v627_v22  ;;  %vm766_vm6 = vcmp.lt.s32.totalorder %v1562_v38, 11 }
 0x1d4   : > { %v656_v15 = vsel %vm654_vm7, %v653_v5, 0.0  ;;  %v657_v16 = vsel %vm655_vm8, %v652_v4, 0.0  ;;  %vm767_vm7 = vcmp.lt.s32.totalorder %v1565_v29, 11 }
 0x1d5   : > { %v662_v24 = vmul.f32 %v1557_v27, %v656_v15  ;;  %v663_v26 = vmul.f32 %v1557_v27, %v657_v16 }
 0x1d6   : > { %v1577_v49 = vpop.permute.xlu1 %733  ;;  %v703_v12 = vpop.permute.xlu0 %702 }
 0x1d7   : > { %v664_v45 = vadd.f32 %v662_v24, %v645_v32  ;;  %v665_v47 = vadd.f32 %v663_v26, %v646_v37 }
 0x1d9   : > { %v681_v57 = vadd.f32 %v677_v31, %v664_v45  ;;  %v682_v36 = vadd.f32 %v679_v48, %v665_v47 }
 0x1da   : > { %v684_v58 = vpop.permute.xlu1 %683  ;;  %v772_v21 = vpop.permute.xlu0 %771 }
 0x1db   : > { %v688_v28 = vsel %vm687_vm9, %v684_v58, %v686_v23  ;;  %v689_v30 = vsel %vm687_vm9, %v686_v23, %v684_v58 }
 0x1dc   : > { %v692_v40 = vsel %vm690_vm10, %v688_v28, 0.0  ;;  %v693_v27 = vsel %vm691_vm11, %v689_v30, 0.0 }
 0x1dd   : > { %v698_v50 = vmul.f32 %v1559_v33, %v692_v40  ;;  %v699_v34 = vmul.f32 %v1559_v33, %v693_v27 }
 0x1de   : > { %v1587_v6 = vpop.permute.xlu1 %752  ;;  %v741_v42 = vpop.permute.xlu0 %740 }
 0x1df   : > { %v700_v33 = vadd.f32 %v698_v50, %v681_v57  ;;  %v701_v35 = vadd.f32 %v699_v34, %v682_v36 }
 0x1e2   : > { %v705_v19 = vpop.permute.xlu1 %704  ;;  %v760_v4 = vpop.permute.xlu0 %759 }
 0x1e3   : > { %v707_v41 = vsel %vm706_vm12, %v703_v12, %v705_v19  ;;  %v708_v44 = vsel %vm706_vm12, %v705_v19, %v703_v12 }
 0x1e4   : > { %v711_v51 = vsel %vm709_vm13, %v707_v41, 0.0  ;;  %v712_v52 = vsel %vm710_vm14, %v708_v44, 0.0 }
 0x1e5   : > { %v717_v59 = vmul.f32 %v1571_v46, %v711_v51  ;;  %v718_v25 = vmul.f32 %v1571_v46, %v712_v52 }
 0x1e6   : > { %v722_v39 = vpop.permute.xlu1 %721 }
 0x1e7   : > { %v719_v5 = vadd.f32 %v717_v59, %v700_v33  ;;  %v720_v7 = vadd.f32 %v718_v25, %v701_v35 }
 0x1ea   : > { %v724_v53 = vpop.permute.xlu1 %723 }
 0x1eb   : > { %v726_v54 = vsel %vm725_vm15, %v722_v39, %v724_v53  ;;  %v727_v43 = vsel %vm725_vm15, %v724_v53, %v722_v39 }
 0x1ec   : > { %v730_v23 = vsel %vm728_vm0, %v726_v54, 0.0  ;;  %v731_v58 = vsel %vm729_vm1, %v727_v43, 0.0 }
 0x1ed   : > { %v736_v61 = vmul.f32 %v1577_v49, %v730_v23  ;;  %v737_v62 = vmul.f32 %v1577_v49, %v731_v58 }
 0x1ee   : > { %v743_v60 = vpop.permute.xlu1 %742 }
 0x1ef   : > { %v745_v55 = vsel %vm744_vm2, %v741_v42, %v743_v60  ;;  %v746_v63 = vsel %vm744_vm2, %v743_v60, %v741_v42  ;;  %v738_v10 = vadd.f32 %v736_v61, %v719_v5  ;;  %v739_v11 = vadd.f32 %v737_v62, %v720_v7 }
 0x1f0   : > { %v749_v46 = vsel %vm747_vm3, %v745_v55, 0.0  ;;  %v750_v56 = vsel %vm748_vm4, %v746_v63, 0.0 }
 0x1f1   : > { %v755_v8 = vmul.f32 %v1587_v6, %v749_v46  ;;  %v756_v49 = vmul.f32 %v1587_v6, %v750_v56 }
 0x1f2   : > { %v762_v9 = vpop.permute.xlu1 %761 }
 0x1f3   : > { %v764_v12 = vsel %vm763_vm5, %v760_v4, %v762_v9  ;;  %v765_v13 = vsel %vm763_vm5, %v762_v9, %v760_v4  ;;  %v757_v29 = vadd.f32 %v755_v8, %v738_v10  ;;  %v758_v15 = vadd.f32 %v756_v49, %v739_v11 }
 0x1f4   : > { %v768_v38 = vsel %vm766_vm6, %v764_v12, 0.0  ;;  %v769_v14 = vsel %vm767_vm7, %v765_v13, 0.0 }
 0x1f5   : > { %v774_v16 = vmul.f32 %v772_v21, %v768_v38  ;;  %v775_v17 = vmul.f32 %v772_v21, %v769_v14 }
 0x1f7   : > { %v776_v18 = vadd.f32 %v774_v16, %v757_v29  ;;  %v777_v19 = vadd.f32 %v775_v17, %v758_v15 }
 0x1f9   : > { %v780_v20 = vcombine.low %v776_v18, %v777_v19 }
 0x1fb   : > { %782 = vst [vmem:[%s1412_s18] sm:$0xff] %v780_v20 }
 0x1fc PF: > { %p1101_p9 = scmp.ne.s32.totalorder %s1254_s24, 2 }
 0x1fd   : > { %v787_v6 = vld [vmem:[%s1742_s5] sm:$0xf] (!%p1101_p9)  ;;  %v1308_v22 = vmov (!%p1101_p9), 1   ;;  %v1309_v24 = vmov (!%p1101_p9), 0   ;;  %v1310_v28 = vmov (!%p1101_p9), 2   ;;  %v795_v30 = vcombine.high (!%p1101_p9), %v1414_v3, %v1414_v3  ;;  %s1311_s24 = smov (!%p1101_p9), 80  }
 0x1fe   : > { %786 = sbr.rel (%p1101_p9) target bundleno = 707 (0x2c3), region = 60  ;;  %1222 = vset.pattern.permute.xlu1 (!%p1101_p9), %v1308_v22  ;;  %1221 = vset.pattern.permute.xlu0 (!%p1101_p9), %v1309_v24  ;;  %v788_v26 = vld [vmem:[%s1743_s6] sm:$0xf] (!%p1101_p9)  ;;  %v1312_v21 = vmov (!%p1101_p9), 3   ;;  %v1313_v31 = vmov (!%p1101_p9), 5   ;;  %s1314_s12 = smov (!%p1101_p9), 64  }
 0x1ff   : > { %829 = vperm.xlu1 (!%p1101_p9), %1222, %v787_v6   ;;  %810 = vperm.xlu0 (!%p1101_p9), %1221, %v787_v6   ;;  %v1315_v32 = vmov (!%p1101_p9), 6   ;;  %v1316_v37 = vmov (!%p1101_p9), 4   ;;  %s1317_s13 = smov (!%p1101_p9), 48   ;;  %s1318_s14 = smov (!%p1101_p9), 32   ;;  %v1319_v39 = vmov (!%p1101_p9), 8   ;;  %v1320_v40 = vmov (!%p1101_p9), 7  }
 0x200   : > { %s1321_s15 = smov (!%p1101_p9), 16   ;;  %s1322_s16 = smov (!%p1101_p9), 112   ;;  %v1323_v27 = vmov (!%p1101_p9), 10   ;;  %v1325_v41 = vmov (!%p1101_p9), 9   ;;  %vm801_vm8 = vcmp.lt.s32.totalorder (!%p1101_p9), %v1401_v1, 80  ;;  %vm821_vm9 = vcmp.lt.s32.totalorder (!%p1101_p9), %v1401_v1, 64 }
 0x201   : > { %s1324_s17 = smov (!%p1101_p9), 96   ;;  %vm804_vm10 = vcmp.ge.s32.totalorder (!%p1101_p9), %v1401_v1, 80  ;;  %v1326_v59 = vmov (!%p1101_p9), 839922192   ;;  %vm840_vm11 = vcmp.lt.s32.totalorder (!%p1101_p9), %v1401_v1, 48  ;;  %vm824_vm12 = vcmp.ge.s32.totalorder (!%p1101_p9), %v1401_v1, 64 }
 0x202   : > { %v897_v25 = vunpack.c.l.s4 (!%p1101_p9), %v1326_v59  ;;  %vm859_vm13 = vcmp.lt.s32.totalorder (!%p1101_p9), %v1401_v1, 32  ;;  %vm843_vm14 = vcmp.ge.s32.totalorder (!%p1101_p9), %v1401_v1, 48  ;;  %v900_v46 = vshrl.u32 (!%p1101_p9), %v328_v0, 7 }
 0x203   : > { %1223 = vset.pattern.permute.xlu1 (!%p1101_p9), %v1310_v28  ;;  %791 = vperm.xlu0 (!%p1101_p9), %1221, %v788_v26   ;;  %vm878_vm15 = vcmp.lt.s32.totalorder (!%p1101_p9), %v1401_v1, 16  ;;  %vm862_vm0 = vcmp.ge.s32.totalorder (!%p1101_p9), %v1401_v1, 32  ;;  %vm881_vm1 = vcmp.ge.s32.totalorder (!%p1101_p9), %v1401_v1, 16  ;;  %vm914_vm2 = vcmp.lt.s32.totalorder (!%p1101_p9), %v1401_v1, 112 }
 0x204   : > { %848 = vperm.xlu1 (!%p1101_p9), %1223, %v787_v6   ;;  %v898_v63 = vunpack.c.0.s8 (!%p1101_p9), %v897_v25  ;;  %vm918_vm3 = vcmp.lt.s32.totalorder (!%p1101_p9), %v1404_v2, 240  ;;  %vm933_vm4 = vcmp.lt.s32.totalorder (!%p1101_p9), %v1401_v1, 96  ;;  %vm937_vm5 = vcmp.lt.s32.totalorder (!%p1101_p9), %v1404_v2, 224 }
 0x205   : > { %vm949_vm6 = vcmp.lt.s32.totalorder %v1404_v2, 208  ;;  %vm961_vm7 = vcmp.lt.s32.totalorder %v1404_v2, 192 }
 0x206   : > { %v901_v13 = vsub.s32 %v898_v63, %v900_v46 }
 0x207   : > { %797 = vrot.lane.b32.xlu0 %v1414_v3, %s1311_s24 }
 0x208   : > { %799 = vrot.lane.b32.xlu1 %v795_v30, %s1311_s24  ;;  %1224 = vset.pattern.permute.xlu0 %v1312_v21 }
 0x209   : > { %1225 = vset.pattern.permute.xlu1 %v1313_v31 }
 0x20b   : > { %867 = vperm.xlu0 %1224, %v787_v6  }
 0x20c   : > { %894 = vperm.xlu1 %1225, %v787_v6  }
 0x20f   : > { %819 = vrot.lane.b32.xlu0 %v795_v30, %s1314_s12 }
 0x210   : > { %817 = vrot.lane.b32.xlu1 %v1414_v3, %s1314_s12  ;;  %1227 = vset.pattern.permute.xlu0 %v1315_v32 }
 0x211   : > { %1226 = vset.pattern.permute.xlu1 %v1316_v37 }
 0x213   : > { %836 = vrot.lane.b32.xlu0 %v1414_v3, %s1317_s13 }
 0x214   : > { %886 = vperm.xlu1 %1226, %v787_v6  }
 0x217   : > { %855 = vrot.lane.b32.xlu0 %v1414_v3, %s1318_s14 }
 0x218   : > { %838 = vrot.lane.b32.xlu1 %v795_v30, %s1317_s13 }
 0x219   : > { %1229 = vset.pattern.permute.xlu1 %v1319_v39 }
 0x21b   : > { %922 = vperm.xlu0 %1227, %v787_v6  }
 0x21c   : > { %857 = vrot.lane.b32.xlu1 %v795_v30, %s1318_s14 }
 0x21f   : > { %1228 = vset.pattern.permute.xlu0 %v1320_v40 }
 0x220   : > { %874 = vrot.lane.b32.xlu1 %v1414_v3, %s1321_s15  ;;  %941 = vperm.xlu0 %1228, %v787_v6  }
 0x224   : > { %876 = vrot.lane.b32.xlu1 %v795_v30, %s1321_s15  ;;  %912 = vrot.lane.b32.xlu0 %v795_v30, %s1322_s16 }
 0x225   : > { %1231 = vset.pattern.permute.xlu0 %v1323_v27 }
 0x228   : > { %953 = vperm.xlu1 %1229, %v787_v6   ;;  %929 = vrot.lane.b32.xlu0 %v1414_v3, %s1324_s17 }
 0x22c   : > { %910 = vrot.lane.b32.xlu1 %v1414_v3, %s1322_s16  ;;  %977 = vperm.xlu0 %1231, %v787_v6  }
 0x22d   : > { %1230 = vset.pattern.permute.xlu1 %v1325_v41 }
 0x230   : > { %965 = vperm.xlu1 %1230, %v787_v6  }
 0x234   : > { %931 = vrot.lane.b32.xlu1 %v795_v30, %s1324_s17 }
 0x27e   : > { %v830_v44 = vpop.permute.xlu1 %829  ;;  %v811_v45 = vpop.permute.xlu0 %810 }
 0x282   : > { %v792_v47 = vpop.permute.xlu0 %791 }
 0x283   : > { %v849_v48 = vpop.permute.xlu1 %848 }
 0x286   : > { %v798_v50 = vpop.permute.xlu0 %797 }
 0x287   : > { %v800_v34 = vpop.permute.xlu1 %799 }
 0x288   : > { %v1664_v58 = vsel %vm801_vm8, %v800_v34, %v798_v50  ;;  %v1674_v62 = vsel %vm801_vm8, %v798_v50, %v800_v34  ;;  %vm973_vm8 = vcmp.lt.s32.totalorder %v1404_v2, 176 }
 0x289   : > { %v806_v61 = vsel %vm804_vm10, %v1664_v58, 0.0  ;;  %v814_v49 = vmul.f32 %v811_v45, %v1674_v62  ;;  %v951_v1 = vsel %vm949_vm6, %v1664_v58, 0.0 }
 0x28a   : > { %v868_v51 = vpop.permute.xlu0 %867  ;;  %v813_v4 = vmul.f32 %v811_v45, %v806_v61 }
 0x28b   : > { %v1659_v52 = vpop.permute.xlu1 %894  ;;  %v816_v18 = vadd.f32 %v814_v49, %v792_v47 }
 0x28c   : > { %v815_v29 = vadd.f32 %v813_v4, %v792_v47  ;;  %v902_v26 = vrot.slane %v1659_v52, %v901_v13 }
 0x28e   : > { %v820_v53 = vpop.permute.xlu0 %819 }
 0x28f   : > { %v818_v42 = vpop.permute.xlu1 %817 }
 0x290   : > { %v1670_v33 = vsel %vm821_vm9, %v820_v53, %v818_v42  ;;  %v1686_v5 = vsel %vm821_vm9, %v818_v42, %v820_v53 }
 0x291   : > { %v826_v56 = vsel %vm824_vm12, %v1670_v33, 0.0  ;;  %v833_v38 = vmul.f32 %v830_v44, %v1686_v5 }
 0x292   : > { %v837_v54 = vpop.permute.xlu0 %836  ;;  %v832_v0 = vmul.f32 %v830_v44, %v826_v56  ;;  %v904_v44 = vmul.f32 %v902_v26, %v1414_v3 }
 0x293   : > { %v887_v43 = vpop.permute.xlu1 %886  ;;  %v835_v28 = vadd.f32 %v833_v38, %v816_v18 }
 0x294   : > { %v834_v6 = vadd.f32 %v832_v0, %v815_v29 }
 0x296   : > { %v856_v36 = vpop.permute.xlu0 %855 }
 0x297   : > { %v839_v57 = vpop.permute.xlu1 %838 }
 0x298   : > { %v1679_v55 = vsel %vm840_vm11, %v839_v57, %v837_v54  ;;  %v1698_v12 = vsel %vm840_vm11, %v837_v54, %v839_v57 }
 0x299   : > { %v845_v9 = vsel %vm843_vm14, %v1679_v55, 0.0  ;;  %v852_v20 = vmul.f32 %v849_v48, %v1698_v12 }
 0x29a   : > { %v923_v35 = vpop.permute.xlu0 %922  ;;  %v851_v15 = vmul.f32 %v849_v48, %v845_v9 }
 0x29b   : > { %v858_v23 = vpop.permute.xlu1 %857  ;;  %v854_v27 = vadd.f32 %v852_v20, %v835_v28 }
 0x29c   : > { %v861_v7 = vsel %vm859_vm13, %v858_v23, %v856_v36  ;;  %v860_v16 = vsel %vm859_vm13, %v856_v36, %v858_v23  ;;  %v853_v21 = vadd.f32 %v851_v15, %v834_v6 }
 0x29d   : > { %v864_v14 = vsel %vm862_vm0, %v861_v7, 0.0  ;;  %v871_v30 = vmul.f32 %v868_v51, %v860_v16 }
 0x29e   : > { %v870_v22 = vmul.f32 %v868_v51, %v864_v14  ;;  %v906_v51 = vcombine.high %v904_v44, %v904_v44 }
 0x29f   : > { %v875_v60 = vpop.permute.xlu1 %874  ;;  %v942_v10 = vpop.permute.xlu0 %941  ;;  %v873_v47 = vadd.f32 %v871_v30, %v854_v27 }
 0x2a0   : > { %v872_v41 = vadd.f32 %v870_v22, %v853_v21 }
 0x2a3   : > { %v877_v8 = vpop.permute.xlu1 %876  ;;  %v913_v32 = vpop.permute.xlu0 %912 }
 0x2a4   : > { %v880_v11 = vsel %vm878_vm15, %v877_v8, %v875_v60  ;;  %v879_v24 = vsel %vm878_vm15, %v875_v60, %v877_v8  ;;  %v963_v8 = vsel %vm961_vm7, %v1670_v33, 0.0 }
 0x2a5   : > { %v883_v19 = vsel %vm881_vm1, %v880_v11, 0.0  ;;  %v890_v39 = vmul.f32 %v887_v43, %v879_v24 }
 0x2a6   : > { %v889_v31 = vmul.f32 %v887_v43, %v883_v19 }
 0x2a7   : > { %v954_v17 = vpop.permute.xlu1 %953  ;;  %v892_v52 = vadd.f32 %v890_v39, %v873_v47  ;;  %v930_v42 = vpop.permute.xlu0 %929 }
 0x2a8   : > { %v891_v48 = vadd.f32 %v889_v31, %v872_v41  ;;  %v957_v56 = vmul.f32 %v954_v17, %v951_v1 }
 0x2a9   : > { %v909_v36 = vadd.f32 %v906_v51, %v892_v52 }
 0x2aa   : > { %v908_v43 = vadd.f32 %v904_v44, %v891_v48 }
 0x2ab   : > { %v911_v37 = vpop.permute.xlu1 %910  ;;  %v978_v4 = vpop.permute.xlu0 %977 }
 0x2ac   : > { %v916_v40 = vsel %vm914_vm2, %v913_v32, %v911_v37  ;;  %v915_v45 = vsel %vm914_vm2, %v911_v37, %v913_v32  ;;  %v980_v58 = vmul.f32 %v978_v4, %v1698_v12 }
 0x2ad   : > { %v920_v50 = vsel %vm918_vm3, %v916_v40, 0.0  ;;  %v925_v53 = vmul.f32 %v923_v35, %v915_v45 }
 0x2ae   : > { %v926_v54 = vmul.f32 %v923_v35, %v920_v50  ;;  %v956_v35 = vmul.f32 %v954_v17, %v1674_v62 }
 0x2af   : > { %v966_v34 = vpop.permute.xlu1 %965  ;;  %v927_v59 = vadd.f32 %v925_v53, %v908_v43 }
 0x2b0   : > { %v928_v61 = vadd.f32 %v926_v54, %v909_v36  ;;  %v968_v49 = vmul.f32 %v966_v34, %v1686_v5  ;;  %v969_v0 = vmul.f32 %v966_v34, %v963_v8 }
 0x2b3   : > { %v932_v57 = vpop.permute.xlu1 %931 }
 0x2b4   : > { %v934_v3 = vsel %vm933_vm4, %v930_v42, %v932_v57  ;;  %v935_v23 = vsel %vm933_vm4, %v932_v57, %v930_v42 }
 0x2b5   : > { %v939_v25 = vsel %vm937_vm5, %v935_v23, 0.0  ;;  %v944_v60 = vmul.f32 %v942_v10, %v934_v3 }
 0x2b6   : > { %v945_v63 = vmul.f32 %v942_v10, %v939_v25  ;;  %v975_v10 = vsel %vm973_vm8, %v1679_v55, 0.0 }
 0x2b7   : > { %v946_v46 = vadd.f32 %v944_v60, %v927_v59  ;;  %v981_v62 = vmul.f32 %v978_v4, %v975_v10 }
 0x2b8   : > { %v947_v7 = vadd.f32 %v945_v63, %v928_v61 }
 0x2b9   : > { %v958_v9 = vadd.f32 %v956_v35, %v946_v46 }
 0x2ba   : > { %v959_v11 = vadd.f32 %v957_v56, %v947_v7 }
 0x2bb   : > { %v970_v13 = vadd.f32 %v968_v49, %v958_v9 }
 0x2bc   : > { %v971_v38 = vadd.f32 %v969_v0, %v959_v11 }
 0x2bd   : > { %v982_v14 = vadd.f32 %v980_v58, %v970_v13 }
 0x2be   : > { %v983_v29 = vadd.f32 %v981_v62, %v971_v38 }
 0x2c0   : > { %v986_v2 = vcombine.low %v982_v14, %v983_v29 }
 0x2c2   : > { %988 = vst [vmem:[%s1412_s18] sm:$0xff] %v986_v2 }
 0x2c3 PF: > { %s17_s28 = sadd.s32 1, %s1270_s28   ;;  %s1753_s24 = smov %s1262_s26 }
 0x2c4   : > { %p14_p10 = scmp.ge.s32.totalorder %s17_s28, 8   ;;  %s1754_s25 = smov %s1266_s27 }
 0x2c5   : > { %s1755_s26 = smov %s1758_s29  ;;  %s1756_s27 = smov %s1762_s30 }
 0x2c6   :  { %16 = sbr.rel (!%p14_p10) target bundleno = 3 (0x3), region = 90 }

</bundles_post_ra>
